<compile_context>
chip_gen: v6e
topology: v6e:2x2x1
jax: 0.10.0
libtpu: 0.0.40
codegen_flags: <defaults>
</compile_context>

<pallas_src>
import functools

import jax
import jax.numpy as jnp
from jax.experimental import pallas as pl
from jax.experimental.pallas import tpu as pltpu


def _round_up(x, m):
    return (x + m - 1) // m * m


def _pick_tile_n(N, block_cols):
    """Pick a lane-dense (multiple-of-128) column tile that divides N if possible."""
    if N <= block_cols:
        return N, N
    for tn in range(block_cols, 127, -128):
        if N % tn == 0:
            return tn, N
    return block_cols, _round_up(N, block_cols)


def _erf_f32(x):
    # Abramowitz & Stegun 7.1.26 (max abs err ~1.5e-7): exact at f32 working
    # precision; uses only exp/mul/add so it lowers cleanly (exp -> EUP slot).
    a1, a2, a3, a4, a5 = (0.254829592, -0.284496736, 1.421413741,
                          -1.453152027, 1.061405429)
    p = 0.3275911
    ax = jnp.abs(x)
    t = 1.0 / (1.0 + p * ax)
    poly = ((((a5 * t + a4) * t + a3) * t + a2) * t + a1) * t
    y = 1.0 - poly * jnp.exp(-ax * ax)
    return jnp.where(x >= 0, y, -y)


def _gelu_exact(x):
    return 0.5 * x * (1.0 + _erf_f32(x * 0.7071067811865476))


# ---------------------------------------------------------------------------
# Fused (optional LayerNorm) + Linear (+ bias, + GELU, + residual) kernel
# ---------------------------------------------------------------------------
def _ln_matmul_kernel(*refs, eps, do_ln, has_bias, activation, has_res):
    it = iter(refs)
    x_ref = next(it)
    if do_ln:
        g_ref = next(it)
        b_ref = next(it)
    w_ref = next(it)
    bias_ref = next(it) if has_bias else None
    res_ref = next(it) if has_res else None
    o_ref = next(it)

    x = x_ref[...].astype(jnp.float32)
    if do_ln:
        mean = jnp.mean(x, axis=-1, keepdims=True)
        cen = x - mean
        var = jnp.mean(cen * cen, axis=-1, keepdims=True)  # biased, as torch
        x = cen * jax.lax.rsqrt(var + eps)
        x = x * g_ref[...].astype(jnp.float32) + b_ref[...].astype(jnp.float32)

    # bf16 MXU operands, f32 accumulation.
    acc = jnp.dot(x.astype(jnp.bfloat16), w_ref[...].astype(jnp.bfloat16),
                  preferred_element_type=jnp.float32)
    if has_bias:
        acc = acc + bias_ref[...].astype(jnp.float32)
    if activation == "gelu":
        acc = _gelu_exact(acc)
    if has_res:
        acc = acc + res_ref[...].astype(jnp.float32)
    o_ref[...] = acc.astype(o_ref.dtype)


def _ln_linear(x, w, bias=None, gamma=None, beta=None, residual=None,
               activation=None, *, eps=1e-5, block_rows=512, block_cols=512):
    """out = act((LN(x) if gamma else x) @ w + bias) + residual.

    x: (..., K); w: (K, N) (stored bf16); bias/residual optional. LN is over K
    and is computed on the VMEM tile right before the MXU matmul.
    """
    do_ln = gamma is not None
    has_bias = bias is not None
    has_res = residual is not None
    lead = x.shape[:-1]
    K = x.shape[-1]
    N = w.shape[1]
    x2 = x.reshape(-1, K)
    M = x2.shape[0]

    tm = min(block_rows, _round_up(M, 8))
    Mp = _round_up(M, tm)
    tn, Np = _pick_tile_n(N, block_cols)

    if Mp != M:
        x2 = jnp.pad(x2, ((0, Mp - M), (0, 0)))
    w_p = w
    if Np != N:
        w_p = jnp.pad(w, ((0, 0), (0, Np - N)))

    # Grid = (column tiles, row tiles) with rows innermost so the weight block
    # stays VMEM-resident across all row tiles (no per-row-tile re-streaming).
    grid = (Np // tn, Mp // tm)
    x_spec = pl.BlockSpec((tm, K), lambda j, i: (i, 0))
    w_spec = pl.BlockSpec((K, tn), lambda j, i: (0, j))
    out_spec = pl.BlockSpec((tm, tn), lambda j, i: (i, j))

    in_specs = [x_spec]
    args = [x2]
    if do_ln:
        prm_spec = pl.BlockSpec((1, K), lambda j, i: (0, 0))  # VMEM-resident
        in_specs += [prm_spec, prm_spec]
        args += [gamma.reshape(1, K).astype(jnp.float32),
                 beta.reshape(1, K).astype(jnp.float32)]
    in_specs.append(w_spec)
    args.append(w_p.astype(jnp.bfloat16))
    if has_bias:
        bias_p = bias
        if Np != N:
            bias_p = jnp.pad(bias, ((0, Np - N),))
        in_specs.append(pl.BlockSpec((1, tn), lambda j, i: (0, j)))
        args.append(bias_p.reshape(1, Np).astype(jnp.float32))
    if has_res:
        r2 = residual.reshape(-1, N)
        if Mp != M or Np != N:
            r2 = jnp.pad(r2, ((0, Mp - M), (0, Np - N)))
        in_specs.append(pl.BlockSpec((tm, tn), lambda j, i: (i, j)))
        args.append(r2)

    out = pl.pallas_call(
        functools.partial(_ln_matmul_kernel, eps=eps, do_ln=do_ln,
                          has_bias=has_bias, activation=activation,
                          has_res=has_res),
        out_shape=jax.ShapeDtypeStruct((Mp, Np), x.dtype),
        grid_spec=pltpu.PrefetchScalarGridSpec(
            num_scalar_prefetch=0,
            grid=grid,
            in_specs=in_specs,
            out_specs=out_spec,
        ),
        compiler_params=pltpu.CompilerParams(
            dimension_semantics=("parallel", "parallel"),
        ),
    )(*args)

    out = out[:M, :N]
    return out.reshape(lead + (N,))


# ---------------------------------------------------------------------------
# Attention core: all heads of one batch element per grid step
# ---------------------------------------------------------------------------
def _attention_kernel(qkv_ref, o_ref, *, heads, dim_head, scale):
    inner = heads * dim_head
    outs = []
    for h in range(heads):  # static unrolled loop over heads
        q = qkv_ref[:, h * dim_head:(h + 1) * dim_head].astype(jnp.float32)
        q = q * scale                                  # fold scale into q
        k = qkv_ref[:, inner + h * dim_head: inner + (h + 1) * dim_head]
        v = qkv_ref[:, 2 * inner + h * dim_head: 2 * inner + (h + 1) * dim_head]
        s = jax.lax.dot_general(q.astype(jnp.bfloat16), k.astype(jnp.bfloat16),
                                (((1,), (1,)), ((), ())),
                                preferred_element_type=jnp.float32)
        s = s - jnp.max(s, axis=-1, keepdims=True)
        p = jnp.exp(s)
        p = p * pl.reciprocal(jnp.sum(p, axis=-1, keepdims=True), approx=True)
        o = jnp.dot(p.astype(jnp.bfloat16), v.astype(jnp.bfloat16),
                    preferred_element_type=jnp.float32)
        outs.append(o)
    # Single lane-dense store in 'b n (h d)' layout (no head-merge transpose).
    o_ref[...] = jnp.concatenate(outs, axis=-1).astype(o_ref.dtype)


def attention_pallas(qkv, *, heads, dim_head, scale):
    """qkv: (B, S, 3*H*dh) -> (B, S, H*dh)."""
    B, S, three_inner = qkv.shape
    inner = heads * dim_head
    in_spec = pl.BlockSpec((None, S, three_inner), lambda b: (b, 0, 0))
    out_spec = pl.BlockSpec((None, S, inner), lambda b: (b, 0, 0))
    return pl.pallas_call(
        functools.partial(_attention_kernel, heads=heads, dim_head=dim_head,
                          scale=scale),
        out_shape=jax.ShapeDtypeStruct((B, S, inner), qkv.dtype),
        grid_spec=pltpu.PrefetchScalarGridSpec(
            num_scalar_prefetch=0,
            grid=(B,),
            in_specs=[in_spec],
            out_specs=out_spec,
        ),
        compiler_params=pltpu.CompilerParams(
            dimension_semantics=("parallel",),
        ),
    )(qkv)


# ---------------------------------------------------------------------------
# ViT forward (Pallas-backed)
# ---------------------------------------------------------------------------
def _attention_block(x, p, *, heads, dim_head):
    scale = dim_head ** -0.5
    # PreNorm fused into the QKV projection (to_qkv has no bias).
    qkv = _ln_linear(x, p["w_qkv"], gamma=p["ln1_g"], beta=p["ln1_b"])
    o = attention_pallas(qkv, heads=heads, dim_head=dim_head, scale=scale)
    # TODO(synk): attention/out dropout p=0.0 (eval) -> identity.
    # Residual fused into the out-projection epilogue.
    return _ln_linear(o, p["w_out"], bias=p["b_out"], residual=x)


def _ff_block(x, p):
    # PreNorm + up-proj + exact-erf GELU fused into one kernel.
    h = _ln_linear(x, p["w1"], bias=p["b1"], gamma=p["ln2_g"], beta=p["ln2_b"],
                   activation="gelu")
    # TODO(synk): FFN dropout p=0.0 -> identity.
    # Down-projection with the residual add fused in the epilogue.
    return _ln_linear(h, p["w2"], bias=p["b2"], residual=x)


def vit_forward(img, params, *, patch_size, heads, dim_head, pool="cls"):
    B, C, Hh, Ww = img.shape
    ph = pw = patch_size
    h, w = Hh // ph, Ww // pw
    # Rearrange('b c (h p1) (w p2) -> b (h w) (p1 p2 c)')
    x = img.reshape(B, C, h, ph, w, pw).transpose(0, 2, 4, 3, 5, 1).reshape(
        B, h * w, ph * pw * C)
    x = _ln_linear(x, params["patch_w"], bias=params["patch_b"])
    n = x.shape[1]
    cls = jnp.broadcast_to(params["cls_token"], (B, 1, x.shape[-1]))
    x = jnp.concatenate([cls, x], axis=1)
    x = x + params["pos_embedding"][:, : n + 1]
    # TODO(synk): emb_dropout p=0.0 -> identity.
    for p in params["layers"]:
        x = _attention_block(x, p, heads=heads, dim_head=dim_head)
        x = _ff_block(x, p)
    x = jnp.mean(x, axis=1) if pool == "mean" else x[:, 0]
    # mlp_head = LayerNorm + Linear, fused into one kernel.
    return _ln_linear(x, params["head_w"], bias=params["head_b"],
                      gamma=params["head_ln_g"], beta=params["head_ln_b"])


# ---------------------------------------------------------------------------
# Pure-JAX f32 reference (mirrors the PyTorch module)
# ---------------------------------------------------------------------------
def _layernorm_ref(x, g, b, eps=1e-5):
    m = jnp.mean(x, axis=-1, keepdims=True)
    v = jnp.mean((x - m) ** 2, axis=-1, keepdims=True)
    return (x - m) * jax.lax.rsqrt(v + eps) * g + b


def vit_forward_ref(img, params, *, patch_size, heads, dim_head, pool="cls"):
    f32 = lambda t: t.astype(jnp.float32)
    B, C, Hh, Ww = img.shape
    ph = pw = patch_size
    h, w = Hh // ph, Ww // pw
    x = img.reshape(B, C, h, ph, w, pw).transpose(0, 2, 4, 3, 5, 1).reshape(
        B, h * w, ph * pw * C)
    x = x @ f32(params["patch_w"]) + params["patch_b"]
    n = x.shape[1]
    cls = jnp.broadcast_to(params["cls_token"], (B, 1, x.shape[-1]))
    x = jnp.concatenate([cls, x], axis=1)
    x = x + params["pos_embedding"][:, : n + 1]
    for p in params["layers"]:
        y = _layernorm_ref(x, p["ln1_g"], p["ln1_b"])
        qkv = y @ f32(p["w_qkv"])
        q, k, v = jnp.split(qkv, 3, axis=-1)

        def to_heads(t):
            return t.reshape(B, -1, heads, dim_head).transpose(0, 2, 1, 3)

        q, k, v = to_heads(q), to_heads(k), to_heads(v)
        dots = jnp.einsum("bhqd,bhkd->bhqk", q, k) * (dim_head ** -0.5)
        attn = jax.nn.softmax(dots, axis=-1)
        o = jnp.einsum("bhqk,bhkd->bhqd", attn, v)
        o = o.transpose(0, 2, 1, 3).reshape(B, -1, heads * dim_head)
        x = (o @ f32(p["w_out"]) + p["b_out"]) + x
        y = _layernorm_ref(x, p["ln2_g"], p["ln2_b"])
        hdn = jax.nn.gelu(y @ f32(p["w1"]) + p["b1"], approximate=False)
        x = (hdn @ f32(p["w2"]) + p["b2"]) + x
    x = jnp.mean(x, axis=1) if pool == "mean" else x[:, 0]
    y = _layernorm_ref(x, params["head_ln_g"], params["head_ln_b"])
    return y @ f32(params["head_w"]) + params["head_b"]


# ---------------------------------------------------------------------------
# Parameter init (weights stored bf16, everything else f32) + demo
# ---------------------------------------------------------------------------
def init_vit_params(key, *, image_size, patch_size, channels, dim, depth,
                    heads, dim_head, mlp_dim, num_classes):
    num_patches = (image_size // patch_size) ** 2
    patch_dim = channels * patch_size * patch_size
    inner_dim = heads * dim_head
    keys = iter(jax.random.split(key, 64))

    def nrm(shape, scale):
        return jax.random.normal(next(keys), shape, dtype=jnp.float32) * scale

    bf = lambda t: t.astype(jnp.bfloat16)  # MXU-side weight storage

    params = {
        "patch_w": bf(nrm((patch_dim, dim), 0.02)),
        "patch_b": nrm((dim,), 0.02),
        "pos_embedding": nrm((1, num_patches + 1, dim), 1.0),
        "cls_token": nrm((1, 1, dim), 1.0),
        "layers": [],
        "head_ln_g": 1.0 + nrm((dim,), 0.1),
        "head_ln_b": nrm((dim,), 0.1),
        "head_w": bf(nrm((dim, num_classes), 0.02)),
        "head_b": nrm((num_classes,), 0.02),
    }
    for _ in range(depth):
        params["layers"].append({
            "ln1_g": 1.0 + nrm((dim,), 0.1),
            "ln1_b": nrm((dim,), 0.1),
            "w_qkv": bf(nrm((dim, inner_dim * 3), 0.02)),  # bias=False
            "w_out": bf(nrm((inner_dim, dim), 0.02)),
            "b_out": nrm((dim,), 0.02),
            "ln2_g": 1.0 + nrm((dim,), 0.1),
            "ln2_b": nrm((dim,), 0.1),
            "w1": bf(nrm((dim, mlp_dim), 0.02)),
            "b1": nrm((mlp_dim,), 0.02),
            "w2": bf(nrm((mlp_dim, dim), 0.02)),
            "b2": nrm((dim,), 0.02),
        })
    return params


if __name__ == "__main__":
    # Small demo config; dim=128 keeps the normalized axis lane-dense.
    image_size, patch_size, channels = 16, 8, 3
    dim, depth, heads, dim_head = 128, 2, 4, 32
    mlp_dim, num_classes, batch = 256, 10, 2

    key = jax.random.PRNGKey(0)
    k_img, k_par = jax.random.split(key)
    img = jax.random.normal(k_img, (batch, channels, image_size, image_size),
                            dtype=jnp.float32)
    params = init_vit_params(
        k_par, image_size=image_size, patch_size=patch_size, channels=channels,
        dim=dim, depth=depth, heads=heads, dim_head=dim_head, mlp_dim=mlp_dim,
        num_classes=num_classes)

    fwd = jax.jit(functools.partial(vit_forward, patch_size=patch_size,
                                    heads=heads, dim_head=dim_head))
    out = jax.block_until_ready(fwd(img, params))

    ref = vit_forward_ref(img, params, patch_size=patch_size, heads=heads,
                          dim_head=dim_head)
    assert out.shape == (batch, num_classes)
    # bf16 MXU operands + approx reciprocal -> relaxed tolerance vs f32 ref.
    err = float(jnp.max(jnp.abs(out.astype(jnp.float32) - ref)))
    denom = float(jnp.max(jnp.abs(ref)))
    assert err <= 0.05 * denom + 1e-3, (err, denom)
    print("KERNEL_OK")
</pallas_src>

<mosaic_0001>
module attributes {stable_mosaic.version = 11 : i64} {
  func.func @_ln_matmul_kernel(%arg0: i32, %arg1: i32, %arg2: memref<8x192xf32, #tpu.memory_space<vmem>>, %arg3: memref<192x128xbf16, #tpu.memory_space<vmem>>, %arg4: memref<1x128xf32, #tpu.memory_space<vmem>>, %arg5: memref<8x128xf32, #tpu.memory_space<vmem>>) attributes {dimension_semantics = [#tpu.dimension_semantics<parallel>, #tpu.dimension_semantics<parallel>], iteration_bounds = array<i64: 1, 1>, scalar_prefetch = 0 : i64, scratch_operands = 0 : i64, tpu.core_type = #tpu.core_type<tc>, window_params = [{transform_indices = @transform_0, window_bounds = array<i64: 8, 192>}, {transform_indices = @transform_1, window_bounds = array<i64: 192, 128>}, {transform_indices = @transform_2, window_bounds = array<i64: 1, 128>}, {transform_indices = @transform_3, window_bounds = array<i64: 8, 128>}]} {
    %c0 = arith.constant 0 : index
    %c0_0 = arith.constant 0 : index
    %0 = vector.load %arg2[%c0, %c0_0] : memref<8x192xf32, #tpu.memory_space<vmem>>, vector<8x192xf32>
    %1 = arith.truncf %0 : vector<8x192xf32> to vector<8x192xbf16>
    %c0_1 = arith.constant 0 : index
    %c0_2 = arith.constant 0 : index
    %2 = vector.load %arg3[%c0_1, %c0_2] : memref<192x128xbf16, #tpu.memory_space<vmem>>, vector<192x128xbf16>
    %cst = arith.constant dense<0.000000e+00> : vector<8x128xf32>
    %3 = tpu.matmul %1, %2, %cst {dimension_numbers = #tpu.dot_dimension_numbers<[1], [0], [0], [1], [0, 0, 1, 1], [], []>} : vector<8x192xbf16>, vector<192x128xbf16>, vector<8x128xf32> -> vector<8x128xf32>
    %c0_3 = arith.constant 0 : index
    %c0_4 = arith.constant 0 : index
    %4 = vector.load %arg4[%c0_3, %c0_4] : memref<1x128xf32, #tpu.memory_space<vmem>>, vector<1x128xf32>
    %5 = vector.broadcast %4 : vector<1x128xf32> to vector<8x128xf32>
    %6 = arith.addf %3, %5 : vector<8x128xf32>
    %c0_5 = arith.constant 0 : index
    %c0_6 = arith.constant 0 : index
    %7 = vector.load %arg5[%c0_5, %c0_6] : memref<8x128xf32, #tpu.memory_space<vmem>>, vector<8x128xf32>
    tpu.vector_store %arg5[%c0_5, %c0_6], %6 {strides = array<i32>} : memref<8x128xf32, #tpu.memory_space<vmem>>, vector<8x128xf32>,
    return
  }
  func.func @transform_0(%arg0: i32, %arg1: i32) -> (i32, i32) {
    %c0_i32 = arith.constant 0 : i32
    %c0_i32_0 = arith.constant 0 : i32
    return %arg1, %c0_i32 : i32, i32
  }
  func.func @transform_1(%arg0: i32, %arg1: i32) -> (i32, i32) {
    %c0_i32 = arith.constant 0 : i32
    %c0_i32_0 = arith.constant 0 : i32
    return %c0_i32, %arg0 : i32, i32
  }
  func.func @transform_2(%arg0: i32, %arg1: i32) -> (i32, i32) {
    %c0_i32 = arith.constant 0 : i32
    %c0_i32_0 = arith.constant 0 : i32
    return %c0_i32, %arg0 : i32, i32
  }
  func.func @transform_3(%arg0: i32, %arg1: i32) -> (i32, i32) {
    %c0_i32 = arith.constant 0 : i32
    return %arg1, %arg0 : i32, i32
  }
}

module attributes {stable_mosaic.version = 11 : i64} {
  func.func @_ln_matmul_kernel(%arg0: i32, %arg1: i32, %arg2: memref<16x128xf32, #tpu.memory_space<vmem>>, %arg3: memref<128x128xbf16, #tpu.memory_space<vmem>>, %arg4: memref<1x128xf32, #tpu.memory_space<vmem>>, %arg5: memref<16x128xf32, #tpu.memory_space<vmem>>, %arg6: memref<16x128xf32, #tpu.memory_space<vmem>>) attributes {dimension_semantics = [#tpu.dimension_semantics<parallel>, #tpu.dimension_semantics<parallel>], iteration_bounds = array<i64: 1, 1>, scalar_prefetch = 0 : i64, scratch_operands = 0 : i64, tpu.core_type = #tpu.core_type<tc>, window_params = [{transform_indices = @transform_0, window_bounds = array<i64: 16, 128>}, {transform_indices = @transform_1, window_bounds = array<i64: 128, 128>}, {transform_indices = @transform_2, window_bounds = array<i64: 1, 128>}, {transform_indices = @transform_3, window_bounds = array<i64: 16, 128>}, {transform_indices = @transform_4, window_bounds = array<i64: 16, 128>}]} {
    %c0 = arith.constant 0 : index
    %c0_0 = arith.constant 0 : index
    %0 = vector.load %arg2[%c0, %c0_0] : memref<16x128xf32, #tpu.memory_space<vmem>>, vector<16x128xf32>
    %1 = arith.truncf %0 : vector<16x128xf32> to vector<16x128xbf16>
    %c0_1 = arith.constant 0 : index
    %c0_2 = arith.constant 0 : index
    %2 = vector.load %arg3[%c0_1, %c0_2] : memref<128x128xbf16, #tpu.memory_space<vmem>>, vector<128x128xbf16>
    %cst = arith.constant dense<0.000000e+00> : vector<16x128xf32>
    %3 = tpu.matmul %1, %2, %cst {dimension_numbers = #tpu.dot_dimension_numbers<[1], [0], [0], [1], [0, 0, 1, 1], [], []>} : vector<16x128xbf16>, vector<128x128xbf16>, vector<16x128xf32> -> vector<16x128xf32>
    %c0_3 = arith.constant 0 : index
    %c0_4 = arith.constant 0 : index
    %4 = vector.load %arg4[%c0_3, %c0_4] : memref<1x128xf32, #tpu.memory_space<vmem>>, vector<1x128xf32>
    %5 = vector.broadcast %4 : vector<1x128xf32> to vector<16x128xf32>
    %6 = arith.addf %3, %5 : vector<16x128xf32>
    %c0_5 = arith.constant 0 : index
    %c0_6 = arith.constant 0 : index
    %7 = vector.load %arg5[%c0_5, %c0_6] : memref<16x128xf32, #tpu.memory_space<vmem>>, vector<16x128xf32>
    %8 = arith.addf %6, %7 : vector<16x128xf32>
    %c0_7 = arith.constant 0 : index
    %c0_8 = arith.constant 0 : index
    %9 = vector.load %arg6[%c0_7, %c0_8] : memref<16x128xf32, #tpu.memory_space<vmem>>, vector<16x128xf32>
    tpu.vector_store %arg6[%c0_7, %c0_8], %8 {strides = array<i32>} : memref<16x128xf32, #tpu.memory_space<vmem>>, vector<16x128xf32>,
    return
  }
  func.func @transform_0(%arg0: i32, %arg1: i32) -> (i32, i32) {
    %c0_i32 = arith.constant 0 : i32
    %c0_i32_0 = arith.constant 0 : i32
    return %arg1, %c0_i32 : i32, i32
  }
  func.func @transform_1(%arg0: i32, %arg1: i32) -> (i32, i32) {
    %c0_i32 = arith.constant 0 : i32
    %c0_i32_0 = arith.constant 0 : i32
    return %c0_i32, %arg0 : i32, i32
  }
  func.func @transform_2(%arg0: i32, %arg1: i32) -> (i32, i32) {
    %c0_i32 = arith.constant 0 : i32
    %c0_i32_0 = arith.constant 0 : i32
    return %c0_i32, %arg0 : i32, i32
  }
  func.func @transform_3(%arg0: i32, %arg1: i32) -> (i32, i32) {
    %c0_i32 = arith.constant 0 : i32
    return %arg1, %arg0 : i32, i32
  }
  func.func @transform_4(%arg0: i32, %arg1: i32) -> (i32, i32) {
    %c0_i32 = arith.constant 0 : i32
    return %arg1, %arg0 : i32, i32
  }
}

module attributes {stable_mosaic.version = 11 : i64} {
  func.func @_ln_matmul_kernel(%arg0: i32, %arg1: i32, %arg2: memref<16x128xf32, #tpu.memory_space<vmem>>, %arg3: memref<1x128xf32, #tpu.memory_space<vmem>>, %arg4: memref<1x128xf32, #tpu.memory_space<vmem>>, %arg5: memref<128x384xbf16, #tpu.memory_space<vmem>>, %arg6: memref<16x384xf32, #tpu.memory_space<vmem>>) attributes {dimension_semantics = [#tpu.dimension_semantics<parallel>, #tpu.dimension_semantics<parallel>], iteration_bounds = array<i64: 1, 1>, scalar_prefetch = 0 : i64, scratch_operands = 0 : i64, tpu.core_type = #tpu.core_type<tc>, window_params = [{transform_indices = @transform_0, window_bounds = array<i64: 16, 128>}, {pipeline_mode = #tpu.pipeline_mode<synchronous>, transform_indices = @transform_1, window_bounds = array<i64: 1, 128>}, {pipeline_mode = #tpu.pipeline_mode<synchronous>, transform_indices = @transform_2, window_bounds = array<i64: 1, 128>}, {transform_indices = @transform_3, window_bounds = array<i64: 128, 384>}, {transform_indices = @transform_4, window_bounds = array<i64: 16, 384>}]} {
    %c0 = arith.constant 0 : index
    %c0_0 = arith.constant 0 : index
    %0 = vector.load %arg2[%c0, %c0_0] : memref<16x128xf32, #tpu.memory_space<vmem>>, vector<16x128xf32>
    %cst = arith.constant dense<0.000000e+00> : vector<16xf32>
    %1 = vector.multi_reduction <add>, %0, %cst [1] : vector<16x128xf32> to vector<16xf32>
    %2 = vector.shape_cast %1 : vector<16xf32> to vector<16x1xf32>
    %cst_1 = arith.constant 1.280000e+02 : f32
    %3 = vector.broadcast %cst_1 : f32 to vector<16x1xf32>
    %4 = arith.divf %2, %3 : vector<16x1xf32>
    %5 = vector.broadcast %4 : vector<16x1xf32> to vector<16x128xf32>
    %6 = arith.subf %0, %5 : vector<16x128xf32>
    %7 = arith.mulf %6, %6 : vector<16x128xf32>
    %cst_2 = arith.constant dense<0.000000e+00> : vector<16xf32>
    %8 = vector.multi_reduction <add>, %7, %cst_2 [1] : vector<16x128xf32> to vector<16xf32>
    %9 = vector.shape_cast %8 : vector<16xf32> to vector<16x1xf32>
    %cst_3 = arith.constant 1.280000e+02 : f32
    %10 = vector.broadcast %cst_3 : f32 to vector<16x1xf32>
    %11 = arith.divf %9, %10 : vector<16x1xf32>
    %cst_4 = arith.constant 9.99999974E-6 : f32
    %12 = vector.broadcast %cst_4 : f32 to vector<16x1xf32>
    %13 = arith.addf %11, %12 : vector<16x1xf32>
    %14 = math.rsqrt %13 : vector<16x1xf32>
    %15 = vector.broadcast %14 : vector<16x1xf32> to vector<16x128xf32>
    %16 = arith.mulf %6, %15 : vector<16x128xf32>
    %c0_5 = arith.constant 0 : index
    %c0_6 = arith.constant 0 : index
    %17 = vector.load %arg3[%c0_5, %c0_6] : memref<1x128xf32, #tpu.memory_space<vmem>>, vector<1x128xf32>
    %18 = vector.broadcast %17 : vector<1x128xf32> to vector<16x128xf32>
    %19 = arith.mulf %16, %18 : vector<16x128xf32>
    %c0_7 = arith.constant 0 : index
    %c0_8 = arith.constant 0 : index
    %20 = vector.load %arg4[%c0_7, %c0_8] : memref<1x128xf32, #tpu.memory_space<vmem>>, vector<1x128xf32>
    %21 = vector.broadcast %20 : vector<1x128xf32> to vector<16x128xf32>
    %22 = arith.addf %19, %21 : vector<16x128xf32>
    %23 = arith.truncf %22 : vector<16x128xf32> to vector<16x128xbf16>
    %c0_9 = arith.constant 0 : index
    %c0_10 = arith.constant 0 : index
    %24 = vector.load %arg5[%c0_9, %c0_10] : memref<128x384xbf16, #tpu.memory_space<vmem>>, vector<128x384xbf16>
    %cst_11 = arith.constant dense<0.000000e+00> : vector<16x384xf32>
    %25 = tpu.matmul %23, %24, %cst_11 {dimension_numbers = #tpu.dot_dimension_numbers<[1], [0], [0], [1], [0, 0, 1, 1], [], []>} : vector<16x128xbf16>, vector<128x384xbf16>, vector<16x384xf32> -> vector<16x384xf32>
    %c0_12 = arith.constant 0 : index
    %c0_13 = arith.constant 0 : index
    %26 = vector.load %arg6[%c0_12, %c0_13] : memref<16x384xf32, #tpu.memory_space<vmem>>, vector<16x384xf32>
    tpu.vector_store %arg6[%c0_12, %c0_13], %25 {strides = array<i32>} : memref<16x384xf32, #tpu.memory_space<vmem>>, vector<16x384xf32>,
    return
  }
  func.func @transform_0(%arg0: i32, %arg1: i32) -> (i32, i32) {
    %c0_i32 = arith.constant 0 : i32
    %c0_i32_0 = arith.constant 0 : i32
    return %arg1, %c0_i32 : i32, i32
  }
  func.func @transform_1(%arg0: i32, %arg1: i32) -> (i32, i32) {
    %c0_i32 = arith.constant 0 : i32
    %c0_i32_0 = arith.constant 0 : i32
    %c0_i32_1 = arith.constant 0 : i32
    return %c0_i32, %c0_i32_0 : i32, i32
  }
  func.func @transform_2(%arg0: i32, %arg1: i32) -> (i32, i32) {
    %c0_i32 = arith.constant 0 : i32
    %c0_i32_0 = arith.constant 0 : i32
    %c0_i32_1 = arith.constant 0 : i32
    return %c0_i32, %c0_i32_0 : i32, i32
  }
  func.func @transform_3(%arg0: i32, %arg1: i32) -> (i32, i32) {
    %c0_i32 = arith.constant 0 : i32
    %c0_i32_0 = arith.constant 0 : i32
    return %c0_i32, %arg0 : i32, i32
  }
  func.func @transform_4(%arg0: i32, %arg1: i32) -> (i32, i32) {
    %c0_i32 = arith.constant 0 : i32
    return %arg1, %arg0 : i32, i32
  }
}

module attributes {stable_mosaic.version = 11 : i64} {
  func.func @_attention_kernel(%arg0: i32, %arg1: memref<1x5x384xf32, #tpu.memory_space<vmem>>, %arg2: memref<1x5x128xf32, #tpu.memory_space<vmem>>) attributes {dimension_semantics = [#tpu.dimension_semantics<parallel>], iteration_bounds = array<i64: 2>, scalar_prefetch = 0 : i64, scratch_operands = 0 : i64, tpu.core_type = #tpu.core_type<tc>, window_params = [{transform_indices = @transform_0, window_bounds = array<i64: 1, 5, 384>}, {transform_indices = @transform_1, window_bounds = array<i64: 1, 5, 128>}]} {
    %c0 = arith.constant 0 : index
    %c0_0 = arith.constant 0 : index
    %c0_1 = arith.constant 0 : index
    %0 = vector.load %arg1[%c0, %c0_0, %c0_1] : memref<1x5x384xf32, #tpu.memory_space<vmem>>, vector<1x5x32xf32>
    %1 = vector.shape_cast %0 : vector<1x5x32xf32> to vector<5x32xf32>
    %cst = arith.constant 0.176776692 : f32
    %2 = vector.broadcast %cst : f32 to vector<5x32xf32>
    %3 = arith.mulf %1, %2 : vector<5x32xf32>
    %c0_2 = arith.constant 0 : index
    %c0_3 = arith.constant 0 : index
    %c128 = arith.constant 128 : index
    %4 = vector.load %arg1[%c0_2, %c0_3, %c128] : memref<1x5x384xf32, #tpu.memory_space<vmem>>, vector<1x5x32xf32>
    %5 = vector.shape_cast %4 : vector<1x5x32xf32> to vector<5x32xf32>
    %c0_4 = arith.constant 0 : index
    %c0_5 = arith.constant 0 : index
    %c256 = arith.constant 256 : index
    %6 = vector.load %arg1[%c0_4, %c0_5, %c256] : memref<1x5x384xf32, #tpu.memory_space<vmem>>, vector<1x5x32xf32>
    %7 = vector.shape_cast %6 : vector<1x5x32xf32> to vector<5x32xf32>
    %8 = arith.truncf %3 : vector<5x32xf32> to vector<5x32xbf16>
    %9 = arith.truncf %5 : vector<5x32xf32> to vector<5x32xbf16>
    %cst_6 = arith.constant dense<0.000000e+00> : vector<5x5xf32>
    %10 = tpu.matmul %8, %9, %cst_6 {dimension_numbers = #tpu.dot_dimension_numbers<[1], [1], [0], [0], [0, 0, 1, 0], [], []>} : vector<5x32xbf16>, vector<5x32xbf16>, vector<5x5xf32> -> vector<5x5xf32>
    %cst_7 = arith.constant dense<0xFF800000> : vector<5xf32>
    %11 = vector.multi_reduction <maximumf>, %10, %cst_7 [1] : vector<5x5xf32> to vector<5xf32>
    %12 = vector.shape_cast %11 : vector<5xf32> to vector<5x1xf32>
    %13 = vector.broadcast %12 : vector<5x1xf32> to vector<5x5xf32>
    %14 = arith.subf %10, %13 : vector<5x5xf32>
    %15 = math.exp %14 : vector<5x5xf32>
    %cst_8 = arith.constant dense<0.000000e+00> : vector<5xf32>
    %16 = vector.multi_reduction <add>, %15, %cst_8 [1] : vector<5x5xf32> to vector<5xf32>
    %17 = vector.shape_cast %16 : vector<5xf32> to vector<5x1xf32>
    %18 = tpu.reciprocal %17 {approx = true} : vector<5x1xf32> -> vector<5x1xf32>
    %19 = vector.broadcast %18 : vector<5x1xf32> to vector<5x5xf32>
    %20 = arith.mulf %15, %19 : vector<5x5xf32>
    %21 = arith.truncf %20 : vector<5x5xf32> to vector<5x5xbf16>
    %22 = arith.truncf %7 : vector<5x32xf32> to vector<5x32xbf16>
    %cst_9 = arith.constant dense<0.000000e+00> : vector<5x32xf32>
    %23 = tpu.matmul %21, %22, %cst_9 {dimension_numbers = #tpu.dot_dimension_numbers<[1], [0], [0], [1], [0, 0, 1, 1], [], []>} : vector<5x5xbf16>, vector<5x32xbf16>, vector<5x32xf32> -> vector<5x32xf32>
    %c0_10 = arith.constant 0 : index
    %c0_11 = arith.constant 0 : index
    %c32 = arith.constant 32 : index
    %24 = vector.load %arg1[%c0_10, %c0_11, %c32] : memref<1x5x384xf32, #tpu.memory_space<vmem>>, vector<1x5x32xf32>
    %25 = vector.shape_cast %24 : vector<1x5x32xf32> to vector<5x32xf32>
    %cst_12 = arith.constant 0.176776692 : f32
    %26 = vector.broadcast %cst_12 : f32 to vector<5x32xf32>
    %27 = arith.mulf %25, %26 : vector<5x32xf32>
    %c0_13 = arith.constant 0 : index
    %c0_14 = arith.constant 0 : index
    %c160 = arith.constant 160 : index
    %28 = vector.load %arg1[%c0_13, %c0_14, %c160] : memref<1x5x384xf32, #tpu.memory_space<vmem>>, vector<1x5x32xf32>
    %29 = vector.shape_cast %28 : vector<1x5x32xf32> to vector<5x32xf32>
    %c0_15 = arith.constant 0 : index
    %c0_16 = arith.constant 0 : index
    %c288 = arith.constant 288 : index
    %30 = vector.load %arg1[%c0_15, %c0_16, %c288] : memref<1x5x384xf32, #tpu.memory_space<vmem>>, vector<1x5x32xf32>
    %31 = vector.shape_cast %30 : vector<1x5x32xf32> to vector<5x32xf32>
    %32 = arith.truncf %27 : vector<5x32xf32> to vector<5x32xbf16>
    %33 = arith.truncf %29 : vector<5x32xf32> to vector<5x32xbf16>
    %cst_17 = arith.constant dense<0.000000e+00> : vector<5x5xf32>
    %34 = tpu.matmul %32, %33, %cst_17 {dimension_numbers = #tpu.dot_dimension_numbers<[1], [1], [0], [0], [0, 0, 1, 0], [], []>} : vector<5x32xbf16>, vector<5x32xbf16>, vector<5x5xf32> -> vector<5x5xf32>
    %cst_18 = arith.constant dense<0xFF800000> : vector<5xf32>
    %35 = vector.multi_reduction <maximumf>, %34, %cst_18 [1] : vector<5x5xf32> to vector<5xf32>
    %36 = vector.shape_cast %35 : vector<5xf32> to vector<5x1xf32>
    %37 = vector.broadcast %36 : vector<5x1xf32> to vector<5x5xf32>
    %38 = arith.subf %34, %37 : vector<5x5xf32>
    %39 = math.exp %38 : vector<5x5xf32>
    %cst_19 = arith.constant dense<0.000000e+00> : vector<5xf32>
    %40 = vector.multi_reduction <add>, %39, %cst_19 [1] : vector<5x5xf32> to vector<5xf32>
    %41 = vector.shape_cast %40 : vector<5xf32> to vector<5x1xf32>
    %42 = tpu.reciprocal %41 {approx = true} : vector<5x1xf32> -> vector<5x1xf32>
    %43 = vector.broadcast %42 : vector<5x1xf32> to vector<5x5xf32>
    %44 = arith.mulf %39, %43 : vector<5x5xf32>
    %45 = arith.truncf %44 : vector<5x5xf32> to vector<5x5xbf16>
    %46 = arith.truncf %31 : vector<5x32xf32> to vector<5x32xbf16>
    %cst_20 = arith.constant dense<0.000000e+00> : vector<5x32xf32>
    %47 = tpu.matmul %45, %46, %cst_20 {dimension_numbers = #tpu.dot_dimension_numbers<[1], [0], [0], [1], [0, 0, 1, 1], [], []>} : vector<5x5xbf16>, vector<5x32xbf16>, vector<5x32xf32> -> vector<5x32xf32>
    %c0_21 = arith.constant 0 : index
    %c0_22 = arith.constant 0 : index
    %c64 = arith.constant 64 : index
    %48 = vector.load %arg1[%c0_21, %c0_22, %c64] : memref<1x5x384xf32, #tpu.memory_space<vmem>>, vector<1x5x32xf32>
    %49 = vector.shape_cast %48 : vector<1x5x32xf32> to vector<5x32xf32>
    %cst_23 = arith.constant 0.176776692 : f32
    %50 = vector.broadcast %cst_23 : f32 to vector<5x32xf32>
    %51 = arith.mulf %49, %50 : vector<5x32xf32>
    %c0_24 = arith.constant 0 : index
    %c0_25 = arith.constant 0 : index
    %c192 = arith.constant 192 : index
    %52 = vector.load %arg1[%c0_24, %c0_25, %c192] : memref<1x5x384xf32, #tpu.memory_space<vmem>>, vector<1x5x32xf32>
    %53 = vector.shape_cast %52 : vector<1x5x32xf32> to vector<5x32xf32>
    %c0_26 = arith.constant 0 : index
    %c0_27 = arith.constant 0 : index
    %c320 = arith.constant 320 : index
    %54 = vector.load %arg1[%c0_26, %c0_27, %c320] : memref<1x5x384xf32, #tpu.memory_space<vmem>>, vector<1x5x32xf32>
    %55 = vector.shape_cast %54 : vector<1x5x32xf32> to vector<5x32xf32>
    %56 = arith.truncf %51 : vector<5x32xf32> to vector<5x32xbf16>
    %57 = arith.truncf %53 : vector<5x32xf32> to vector<5x32xbf16>
    %cst_28 = arith.constant dense<0.000000e+00> : vector<5x5xf32>
    %58 = tpu.matmul %56, %57, %cst_28 {dimension_numbers = #tpu.dot_dimension_numbers<[1], [1], [0], [0], [0, 0, 1, 0], [], []>} : vector<5x32xbf16>, vector<5x32xbf16>, vector<5x5xf32> -> vector<5x5xf32>
    %cst_29 = arith.constant dense<0xFF800000> : vector<5xf32>
    %59 = vector.multi_reduction <maximumf>, %58, %cst_29 [1] : vector<5x5xf32> to vector<5xf32>
    %60 = vector.shape_cast %59 : vector<5xf32> to vector<5x1xf32>
    %61 = vector.broadcast %60 : vector<5x1xf32> to vector<5x5xf32>
    %62 = arith.subf %58, %61 : vector<5x5xf32>
    %63 = math.exp %62 : vector<5x5xf32>
    %cst_30 = arith.constant dense<0.000000e+00> : vector<5xf32>
    %64 = vector.multi_reduction <add>, %63, %cst_30 [1] : vector<5x5xf32> to vector<5xf32>
    %65 = vector.shape_cast %64 : vector<5xf32> to vector<5x1xf32>
    %66 = tpu.reciprocal %65 {approx = true} : vector<5x1xf32> -> vector<5x1xf32>
    %67 = vector.broadcast %66 : vector<5x1xf32> to vector<5x5xf32>
    %68 = arith.mulf %63, %67 : vector<5x5xf32>
    %69 = arith.truncf %68 : vector<5x5xf32> to vector<5x5xbf16>
    %70 = arith.truncf %55 : vector<5x32xf32> to vector<5x32xbf16>
    %cst_31 = arith.constant dense<0.000000e+00> : vector<5x32xf32>
    %71 = tpu.matmul %69, %70, %cst_31 {dimension_numbers = #tpu.dot_dimension_numbers<[1], [0], [0], [1], [0, 0, 1, 1], [], []>} : vector<5x5xbf16>, vector<5x32xbf16>, vector<5x32xf32> -> vector<5x32xf32>
    %c0_32 = arith.constant 0 : index
    %c0_33 = arith.constant 0 : index
    %c96 = arith.constant 96 : index
    %72 = vector.load %arg1[%c0_32, %c0_33, %c96] : memref<1x5x384xf32, #tpu.memory_space<vmem>>, vector<1x5x32xf32>
    %73 = vector.shape_cast %72 : vector<1x5x32xf32> to vector<5x32xf32>
    %cst_34 = arith.constant 0.176776692 : f32
    %74 = vector.broadcast %cst_34 : f32 to vector<5x32xf32>
    %75 = arith.mulf %73, %74 : vector<5x32xf32>
    %c0_35 = arith.constant 0 : index
    %c0_36 = arith.constant 0 : index
    %c224 = arith.constant 224 : index
    %76 = vector.load %arg1[%c0_35, %c0_36, %c224] : memref<1x5x384xf32, #tpu.memory_space<vmem>>, vector<1x5x32xf32>
    %77 = vector.shape_cast %76 : vector<1x5x32xf32> to vector<5x32xf32>
    %c0_37 = arith.constant 0 : index
    %c0_38 = arith.constant 0 : index
    %c352 = arith.constant 352 : index
    %78 = vector.load %arg1[%c0_37, %c0_38, %c352] : memref<1x5x384xf32, #tpu.memory_space<vmem>>, vector<1x5x32xf32>
    %79 = vector.shape_cast %78 : vector<1x5x32xf32> to vector<5x32xf32>
    %80 = arith.truncf %75 : vector<5x32xf32> to vector<5x32xbf16>
    %81 = arith.truncf %77 : vector<5x32xf32> to vector<5x32xbf16>
    %cst_39 = arith.constant dense<0.000000e+00> : vector<5x5xf32>
    %82 = tpu.matmul %80, %81, %cst_39 {dimension_numbers = #tpu.dot_dimension_numbers<[1], [1], [0], [0], [0, 0, 1, 0], [], []>} : vector<5x32xbf16>, vector<5x32xbf16>, vector<5x5xf32> -> vector<5x5xf32>
    %cst_40 = arith.constant dense<0xFF800000> : vector<5xf32>
    %83 = vector.multi_reduction <maximumf>, %82, %cst_40 [1] : vector<5x5xf32> to vector<5xf32>
    %84 = vector.shape_cast %83 : vector<5xf32> to vector<5x1xf32>
    %85 = vector.broadcast %84 : vector<5x1xf32> to vector<5x5xf32>
    %86 = arith.subf %82, %85 : vector<5x5xf32>
    %87 = math.exp %86 : vector<5x5xf32>
    %cst_41 = arith.constant dense<0.000000e+00> : vector<5xf32>
    %88 = vector.multi_reduction <add>, %87, %cst_41 [1] : vector<5x5xf32> to vector<5xf32>
    %89 = vector.shape_cast %88 : vector<5xf32> to vector<5x1xf32>
    %90 = tpu.reciprocal %89 {approx = true} : vector<5x1xf32> -> vector<5x1xf32>
    %91 = vector.broadcast %90 : vector<5x1xf32> to vector<5x5xf32>
    %92 = arith.mulf %87, %91 : vector<5x5xf32>
    %93 = arith.truncf %92 : vector<5x5xf32> to vector<5x5xbf16>
    %94 = arith.truncf %79 : vector<5x32xf32> to vector<5x32xbf16>
    %cst_42 = arith.constant dense<0.000000e+00> : vector<5x32xf32>
    %95 = tpu.matmul %93, %94, %cst_42 {dimension_numbers = #tpu.dot_dimension_numbers<[1], [0], [0], [1], [0, 0, 1, 1], [], []>} : vector<5x5xbf16>, vector<5x32xbf16>, vector<5x32xf32> -> vector<5x32xf32>
    %96 = tpu.concatenate %23, %47, %71, %95 in 1 : vector<5x32xf32>, vector<5x32xf32>, vector<5x32xf32>, vector<5x32xf32> -> vector<5x128xf32>
    %c0_43 = arith.constant 0 : index
    %c0_44 = arith.constant 0 : index
    %c0_45 = arith.constant 0 : index
    %97 = vector.load %arg2[%c0_43, %c0_44, %c0_45] : memref<1x5x128xf32, #tpu.memory_space<vmem>>, vector<1x5x128xf32>
    %98 = vector.shape_cast %97 : vector<1x5x128xf32> to vector<5x128xf32>
    %99 = vector.shape_cast %96 : vector<5x128xf32> to vector<1x5x128xf32>
    tpu.vector_store %arg2[%c0_43, %c0_44, %c0_45], %99 {strides = array<i32>} : memref<1x5x128xf32, #tpu.memory_space<vmem>>, vector<1x5x128xf32>,
    return
  }
  func.func @transform_0(%arg0: i32) -> (i32, i32, i32) {
    %c0_i32 = arith.constant 0 : i32
    %c0_i32_0 = arith.constant 0 : i32
    %c0_i32_1 = arith.constant 0 : i32
    return %arg0, %c0_i32, %c0_i32_0 : i32, i32, i32
  }
  func.func @transform_1(%arg0: i32) -> (i32, i32, i32) {
    %c0_i32 = arith.constant 0 : i32
    %c0_i32_0 = arith.constant 0 : i32
    %c0_i32_1 = arith.constant 0 : i32
    return %arg0, %c0_i32, %c0_i32_0 : i32, i32, i32
  }
}

module attributes {stable_mosaic.version = 11 : i64} {
  func.func @_ln_matmul_kernel(%arg0: i32, %arg1: i32, %arg2: memref<16x128xf32, #tpu.memory_space<vmem>>, %arg3: memref<1x128xf32, #tpu.memory_space<vmem>>, %arg4: memref<1x128xf32, #tpu.memory_space<vmem>>, %arg5: memref<128x256xbf16, #tpu.memory_space<vmem>>, %arg6: memref<1x256xf32, #tpu.memory_space<vmem>>, %arg7: memref<16x256xf32, #tpu.memory_space<vmem>>) attributes {dimension_semantics = [#tpu.dimension_semantics<parallel>, #tpu.dimension_semantics<parallel>], iteration_bounds = array<i64: 1, 1>, scalar_prefetch = 0 : i64, scratch_operands = 0 : i64, tpu.core_type = #tpu.core_type<tc>, window_params = [{transform_indices = @transform_0, window_bounds = array<i64: 16, 128>}, {pipeline_mode = #tpu.pipeline_mode<synchronous>, transform_indices = @transform_1, window_bounds = array<i64: 1, 128>}, {pipeline_mode = #tpu.pipeline_mode<synchronous>, transform_indices = @transform_2, window_bounds = array<i64: 1, 128>}, {transform_indices = @transform_3, window_bounds = array<i64: 128, 256>}, {transform_indices = @transform_4, window_bounds = array<i64: 1, 256>}, {transform_indices = @transform_5, window_bounds = array<i64: 16, 256>}]} {
    %c0 = arith.constant 0 : index
    %c0_0 = arith.constant 0 : index
    %0 = vector.load %arg2[%c0, %c0_0] : memref<16x128xf32, #tpu.memory_space<vmem>>, vector<16x128xf32>
    %cst = arith.constant dense<0.000000e+00> : vector<16xf32>
    %1 = vector.multi_reduction <add>, %0, %cst [1] : vector<16x128xf32> to vector<16xf32>
    %2 = vector.shape_cast %1 : vector<16xf32> to vector<16x1xf32>
    %cst_1 = arith.constant 1.280000e+02 : f32
    %3 = vector.broadcast %cst_1 : f32 to vector<16x1xf32>
    %4 = arith.divf %2, %3 : vector<16x1xf32>
    %5 = vector.broadcast %4 : vector<16x1xf32> to vector<16x128xf32>
    %6 = arith.subf %0, %5 : vector<16x128xf32>
    %7 = arith.mulf %6, %6 : vector<16x128xf32>
    %cst_2 = arith.constant dense<0.000000e+00> : vector<16xf32>
    %8 = vector.multi_reduction <add>, %7, %cst_2 [1] : vector<16x128xf32> to vector<16xf32>
    %9 = vector.shape_cast %8 : vector<16xf32> to vector<16x1xf32>
    %cst_3 = arith.constant 1.280000e+02 : f32
    %10 = vector.broadcast %cst_3 : f32 to vector<16x1xf32>
    %11 = arith.divf %9, %10 : vector<16x1xf32>
    %cst_4 = arith.constant 9.99999974E-6 : f32
    %12 = vector.broadcast %cst_4 : f32 to vector<16x1xf32>
    %13 = arith.addf %11, %12 : vector<16x1xf32>
    %14 = math.rsqrt %13 : vector<16x1xf32>
    %15 = vector.broadcast %14 : vector<16x1xf32> to vector<16x128xf32>
    %16 = arith.mulf %6, %15 : vector<16x128xf32>
    %c0_5 = arith.constant 0 : index
    %c0_6 = arith.constant 0 : index
    %17 = vector.load %arg3[%c0_5, %c0_6] : memref<1x128xf32, #tpu.memory_space<vmem>>, vector<1x128xf32>
    %18 = vector.broadcast %17 : vector<1x128xf32> to vector<16x128xf32>
    %19 = arith.mulf %16, %18 : vector<16x128xf32>
    %c0_7 = arith.constant 0 : index
    %c0_8 = arith.constant 0 : index
    %20 = vector.load %arg4[%c0_7, %c0_8] : memref<1x128xf32, #tpu.memory_space<vmem>>, vector<1x128xf32>
    %21 = vector.broadcast %20 : vector<1x128xf32> to vector<16x128xf32>
    %22 = arith.addf %19, %21 : vector<16x128xf32>
    %23 = arith.truncf %22 : vector<16x128xf32> to vector<16x128xbf16>
    %c0_9 = arith.constant 0 : index
    %c0_10 = arith.constant 0 : index
    %24 = vector.load %arg5[%c0_9, %c0_10] : memref<128x256xbf16, #tpu.memory_space<vmem>>, vector<128x256xbf16>
    %cst_11 = arith.constant dense<0.000000e+00> : vector<16x256xf32>
    %25 = tpu.matmul %23, %24, %cst_11 {dimension_numbers = #tpu.dot_dimension_numbers<[1], [0], [0], [1], [0, 0, 1, 1], [], []>} : vector<16x128xbf16>, vector<128x256xbf16>, vector<16x256xf32> -> vector<16x256xf32>
    %c0_12 = arith.constant 0 : index
    %c0_13 = arith.constant 0 : index
    %26 = vector.load %arg6[%c0_12, %c0_13] : memref<1x256xf32, #tpu.memory_space<vmem>>, vector<1x256xf32>
    %27 = vector.broadcast %26 : vector<1x256xf32> to vector<16x256xf32>
    %28 = arith.addf %25, %27 : vector<16x256xf32>
    %cst_14 = arith.constant 5.000000e-01 : f32
    %29 = vector.broadcast %cst_14 : f32 to vector<16x256xf32>
    %30 = arith.mulf %29, %28 : vector<16x256xf32>
    %cst_15 = arith.constant 0.707106769 : f32
    %31 = vector.broadcast %cst_15 : f32 to vector<16x256xf32>
    %32 = arith.mulf %28, %31 : vector<16x256xf32>
    %33 = math.absf %32 : vector<16x256xf32>
    %cst_16 = arith.constant 0.327591091 : f32
    %34 = vector.broadcast %cst_16 : f32 to vector<16x256xf32>
    %35 = arith.mulf %34, %33 : vector<16x256xf32>
    %cst_17 = arith.constant 1.000000e+00 : f32
    %36 = vector.broadcast %cst_17 : f32 to vector<16x256xf32>
    %37 = arith.addf %36, %35 : vector<16x256xf32>
    %cst_18 = arith.constant 1.000000e+00 : f32
    %38 = vector.broadcast %cst_18 : f32 to vector<16x256xf32>
    %39 = arith.divf %38, %37 : vector<16x256xf32>
    %cst_19 = arith.constant 1.06140542 : f32
    %40 = vector.broadcast %cst_19 : f32 to vector<16x256xf32>
    %41 = arith.mulf %40, %39 : vector<16x256xf32>
    %cst_20 = arith.constant -1.45315206 : f32
    %42 = vector.broadcast %cst_20 : f32 to vector<16x256xf32>
    %43 = arith.addf %41, %42 : vector<16x256xf32>
    %44 = arith.mulf %43, %39 : vector<16x256xf32>
    %cst_21 = arith.constant 1.42141378 : f32
    %45 = vector.broadcast %cst_21 : f32 to vector<16x256xf32>
    %46 = arith.addf %44, %45 : vector<16x256xf32>
    %47 = arith.mulf %46, %39 : vector<16x256xf32>
    %cst_22 = arith.constant -0.284496725 : f32
    %48 = vector.broadcast %cst_22 : f32 to vector<16x256xf32>
    %49 = arith.addf %47, %48 : vector<16x256xf32>
    %50 = arith.mulf %49, %39 : vector<16x256xf32>
    %cst_23 = arith.constant 0.254829586 : f32
    %51 = vector.broadcast %cst_23 : f32 to vector<16x256xf32>
    %52 = arith.addf %50, %51 : vector<16x256xf32>
    %53 = arith.mulf %52, %39 : vector<16x256xf32>
    %cst_24 = arith.constant 0.000000e+00 : f32
    %54 = vector.broadcast %cst_24 : f32 to vector<16x256xf32>
    %55 = arith.subf %54, %33 : vector<16x256xf32>
    %56 = arith.mulf %55, %33 : vector<16x256xf32>
    %57 = math.exp %56 : vector<16x256xf32>
    %58 = arith.mulf %53, %57 : vector<16x256xf32>
    %cst_25 = arith.constant 1.000000e+00 : f32
    %59 = vector.broadcast %cst_25 : f32 to vector<16x256xf32>
    %60 = arith.subf %59, %58 : vector<16x256xf32>
    %cst_26 = arith.constant 0.000000e+00 : f32
    %61 = vector.broadcast %cst_26 : f32 to vector<16x256xf32>
    %62 = arith.cmpf oge, %32, %61 : vector<16x256xf32>
    %cst_27 = arith.constant 0.000000e+00 : f32
    %63 = vector.broadcast %cst_27 : f32 to vector<16x256xf32>
    %64 = arith.subf %63, %60 : vector<16x256xf32>
    %65 = arith.select %62, %60, %64 : vector<16x256xi1>, vector<16x256xf32>
    %cst_28 = arith.constant 1.000000e+00 : f32
    %66 = vector.broadcast %cst_28 : f32 to vector<16x256xf32>
    %67 = arith.addf %66, %65 : vector<16x256xf32>
    %68 = arith.mulf %30, %67 : vector<16x256xf32>
    %c0_29 = arith.constant 0 : index
    %c0_30 = arith.constant 0 : index
    %69 = vector.load %arg7[%c0_29, %c0_30] : memref<16x256xf32, #tpu.memory_space<vmem>>, vector<16x256xf32>
    tpu.vector_store %arg7[%c0_29, %c0_30], %68 {strides = array<i32>} : memref<16x256xf32, #tpu.memory_space<vmem>>, vector<16x256xf32>,
    return
  }
  func.func @transform_0(%arg0: i32, %arg1: i32) -> (i32, i32) {
    %c0_i32 = arith.constant 0 : i32
    %c0_i32_0 = arith.constant 0 : i32
    return %arg1, %c0_i32 : i32, i32
  }
  func.func @transform_1(%arg0: i32, %arg1: i32) -> (i32, i32) {
    %c0_i32 = arith.constant 0 : i32
    %c0_i32_0 = arith.constant 0 : i32
    %c0_i32_1 = arith.constant 0 : i32
    return %c0_i32, %c0_i32_0 : i32, i32
  }
  func.func @transform_2(%arg0: i32, %arg1: i32) -> (i32, i32) {
    %c0_i32 = arith.constant 0 : i32
    %c0_i32_0 = arith.constant 0 : i32
    %c0_i32_1 = arith.constant 0 : i32
    return %c0_i32, %c0_i32_0 : i32, i32
  }
  func.func @transform_3(%arg0: i32, %arg1: i32) -> (i32, i32) {
    %c0_i32 = arith.constant 0 : i32
    %c0_i32_0 = arith.constant 0 : i32
    return %c0_i32, %arg0 : i32, i32
  }
  func.func @transform_4(%arg0: i32, %arg1: i32) -> (i32, i32) {
    %c0_i32 = arith.constant 0 : i32
    %c0_i32_0 = arith.constant 0 : i32
    return %c0_i32, %arg0 : i32, i32
  }
  func.func @transform_5(%arg0: i32, %arg1: i32) -> (i32, i32) {
    %c0_i32 = arith.constant 0 : i32
    return %arg1, %arg0 : i32, i32
  }
}

module attributes {stable_mosaic.version = 11 : i64} {
  func.func @_ln_matmul_kernel(%arg0: i32, %arg1: i32, %arg2: memref<16x256xf32, #tpu.memory_space<vmem>>, %arg3: memref<256x128xbf16, #tpu.memory_space<vmem>>, %arg4: memref<1x128xf32, #tpu.memory_space<vmem>>, %arg5: memref<16x128xf32, #tpu.memory_space<vmem>>, %arg6: memref<16x128xf32, #tpu.memory_space<vmem>>) attributes {dimension_semantics = [#tpu.dimension_semantics<parallel>, #tpu.dimension_semantics<parallel>], iteration_bounds = array<i64: 1, 1>, scalar_prefetch = 0 : i64, scratch_operands = 0 : i64, tpu.core_type = #tpu.core_type<tc>, window_params = [{transform_indices = @transform_0, window_bounds = array<i64: 16, 256>}, {transform_indices = @transform_1, window_bounds = array<i64: 256, 128>}, {transform_indices = @transform_2, window_bounds = array<i64: 1, 128>}, {transform_indices = @transform_3, window_bounds = array<i64: 16, 128>}, {transform_indices = @transform_4, window_bounds = array<i64: 16, 128>}]} {
    %c0 = arith.constant 0 : index
    %c0_0 = arith.constant 0 : index
    %0 = vector.load %arg2[%c0, %c0_0] : memref<16x256xf32, #tpu.memory_space<vmem>>, vector<16x256xf32>
    %1 = arith.truncf %0 : vector<16x256xf32> to vector<16x256xbf16>
    %c0_1 = arith.constant 0 : index
    %c0_2 = arith.constant 0 : index
    %2 = vector.load %arg3[%c0_1, %c0_2] : memref<256x128xbf16, #tpu.memory_space<vmem>>, vector<256x128xbf16>
    %cst = arith.constant dense<0.000000e+00> : vector<16x128xf32>
    %3 = tpu.matmul %1, %2, %cst {dimension_numbers = #tpu.dot_dimension_numbers<[1], [0], [0], [1], [0, 0, 1, 1], [], []>} : vector<16x256xbf16>, vector<256x128xbf16>, vector<16x128xf32> -> vector<16x128xf32>
    %c0_3 = arith.constant 0 : index
    %c0_4 = arith.constant 0 : index
    %4 = vector.load %arg4[%c0_3, %c0_4] : memref<1x128xf32, #tpu.memory_space<vmem>>, vector<1x128xf32>
    %5 = vector.broadcast %4 : vector<1x128xf32> to vector<16x128xf32>
    %6 = arith.addf %3, %5 : vector<16x128xf32>
    %c0_5 = arith.constant 0 : index
    %c0_6 = arith.constant 0 : index
    %7 = vector.load %arg5[%c0_5, %c0_6] : memref<16x128xf32, #tpu.memory_space<vmem>>, vector<16x128xf32>
    %8 = arith.addf %6, %7 : vector<16x128xf32>
    %c0_7 = arith.constant 0 : index
    %c0_8 = arith.constant 0 : index
    %9 = vector.load %arg6[%c0_7, %c0_8] : memref<16x128xf32, #tpu.memory_space<vmem>>, vector<16x128xf32>
    tpu.vector_store %arg6[%c0_7, %c0_8], %8 {strides = array<i32>} : memref<16x128xf32, #tpu.memory_space<vmem>>, vector<16x128xf32>,
    return
  }
  func.func @transform_0(%arg0: i32, %arg1: i32) -> (i32, i32) {
    %c0_i32 = arith.constant 0 : i32
    %c0_i32_0 = arith.constant 0 : i32
    return %arg1, %c0_i32 : i32, i32
  }
  func.func @transform_1(%arg0: i32, %arg1: i32) -> (i32, i32) {
    %c0_i32 = arith.constant 0 : i32
    %c0_i32_0 = arith.constant 0 : i32
    return %c0_i32, %arg0 : i32, i32
  }
  func.func @transform_2(%arg0: i32, %arg1: i32) -> (i32, i32) {
    %c0_i32 = arith.constant 0 : i32
    %c0_i32_0 = arith.constant 0 : i32
    return %c0_i32, %arg0 : i32, i32
  }
  func.func @transform_3(%arg0: i32, %arg1: i32) -> (i32, i32) {
    %c0_i32 = arith.constant 0 : i32
    return %arg1, %arg0 : i32, i32
  }
  func.func @transform_4(%arg0: i32, %arg1: i32) -> (i32, i32) {
    %c0_i32 = arith.constant 0 : i32
    return %arg1, %arg0 : i32, i32
  }
}

module attributes {stable_mosaic.version = 11 : i64} {
  func.func @_ln_matmul_kernel(%arg0: i32, %arg1: i32, %arg2: memref<8x128xf32, #tpu.memory_space<vmem>>, %arg3: memref<1x128xf32, #tpu.memory_space<vmem>>, %arg4: memref<1x128xf32, #tpu.memory_space<vmem>>, %arg5: memref<128x10xbf16, #tpu.memory_space<vmem>>, %arg6: memref<1x10xf32, #tpu.memory_space<vmem>>, %arg7: memref<8x10xf32, #tpu.memory_space<vmem>>) attributes {dimension_semantics = [#tpu.dimension_semantics<parallel>, #tpu.dimension_semantics<parallel>], iteration_bounds = array<i64: 1, 1>, scalar_prefetch = 0 : i64, scratch_operands = 0 : i64, tpu.core_type = #tpu.core_type<tc>, window_params = [{transform_indices = @transform_0, window_bounds = array<i64: 8, 128>}, {pipeline_mode = #tpu.pipeline_mode<synchronous>, transform_indices = @transform_1, window_bounds = array<i64: 1, 128>}, {pipeline_mode = #tpu.pipeline_mode<synchronous>, transform_indices = @transform_2, window_bounds = array<i64: 1, 128>}, {transform_indices = @transform_3, window_bounds = array<i64: 128, 10>}, {transform_indices = @transform_4, window_bounds = array<i64: 1, 10>}, {transform_indices = @transform_5, window_bounds = array<i64: 8, 10>}]} {
    %c0 = arith.constant 0 : index
    %c0_0 = arith.constant 0 : index
    %0 = vector.load %arg2[%c0, %c0_0] : memref<8x128xf32, #tpu.memory_space<vmem>>, vector<8x128xf32>
    %cst = arith.constant dense<0.000000e+00> : vector<8xf32>
    %1 = vector.multi_reduction <add>, %0, %cst [1] : vector<8x128xf32> to vector<8xf32>
    %2 = vector.shape_cast %1 : vector<8xf32> to vector<8x1xf32>
    %cst_1 = arith.constant 1.280000e+02 : f32
    %3 = vector.broadcast %cst_1 : f32 to vector<8x1xf32>
    %4 = arith.divf %2, %3 : vector<8x1xf32>
    %5 = vector.broadcast %4 : vector<8x1xf32> to vector<8x128xf32>
    %6 = arith.subf %0, %5 : vector<8x128xf32>
    %7 = arith.mulf %6, %6 : vector<8x128xf32>
    %cst_2 = arith.constant dense<0.000000e+00> : vector<8xf32>
    %8 = vector.multi_reduction <add>, %7, %cst_2 [1] : vector<8x128xf32> to vector<8xf32>
    %9 = vector.shape_cast %8 : vector<8xf32> to vector<8x1xf32>
    %cst_3 = arith.constant 1.280000e+02 : f32
    %10 = vector.broadcast %cst_3 : f32 to vector<8x1xf32>
    %11 = arith.divf %9, %10 : vector<8x1xf32>
    %cst_4 = arith.constant 9.99999974E-6 : f32
    %12 = vector.broadcast %cst_4 : f32 to vector<8x1xf32>
    %13 = arith.addf %11, %12 : vector<8x1xf32>
    %14 = math.rsqrt %13 : vector<8x1xf32>
    %15 = vector.broadcast %14 : vector<8x1xf32> to vector<8x128xf32>
    %16 = arith.mulf %6, %15 : vector<8x128xf32>
    %c0_5 = arith.constant 0 : index
    %c0_6 = arith.constant 0 : index
    %17 = vector.load %arg3[%c0_5, %c0_6] : memref<1x128xf32, #tpu.memory_space<vmem>>, vector<1x128xf32>
    %18 = vector.broadcast %17 : vector<1x128xf32> to vector<8x128xf32>
    %19 = arith.mulf %16, %18 : vector<8x128xf32>
    %c0_7 = arith.constant 0 : index
    %c0_8 = arith.constant 0 : index
    %20 = vector.load %arg4[%c0_7, %c0_8] : memref<1x128xf32, #tpu.memory_space<vmem>>, vector<1x128xf32>
    %21 = vector.broadcast %20 : vector<1x128xf32> to vector<8x128xf32>
    %22 = arith.addf %19, %21 : vector<8x128xf32>
    %23 = arith.truncf %22 : vector<8x128xf32> to vector<8x128xbf16>
    %c0_9 = arith.constant 0 : index
    %c0_10 = arith.constant 0 : index
    %24 = vector.load %arg5[%c0_9, %c0_10] : memref<128x10xbf16, #tpu.memory_space<vmem>>, vector<128x10xbf16>
    %cst_11 = arith.constant dense<0.000000e+00> : vector<8x10xf32>
    %25 = tpu.matmul %23, %24, %cst_11 {dimension_numbers = #tpu.dot_dimension_numbers<[1], [0], [0], [1], [0, 0, 1, 1], [], []>} : vector<8x128xbf16>, vector<128x10xbf16>, vector<8x10xf32> -> vector<8x10xf32>
    %c0_12 = arith.constant 0 : index
    %c0_13 = arith.constant 0 : index
    %26 = vector.load %arg6[%c0_12, %c0_13] : memref<1x10xf32, #tpu.memory_space<vmem>>, vector<1x10xf32>
    %27 = vector.broadcast %26 : vector<1x10xf32> to vector<8x10xf32>
    %28 = arith.addf %25, %27 : vector<8x10xf32>
    %c0_14 = arith.constant 0 : index
    %c0_15 = arith.constant 0 : index
    %29 = vector.load %arg7[%c0_14, %c0_15] : memref<8x10xf32, #tpu.memory_space<vmem>>, vector<8x10xf32>
    tpu.vector_store %arg7[%c0_14, %c0_15], %28 {strides = array<i32>} : memref<8x10xf32, #tpu.memory_space<vmem>>, vector<8x10xf32>,
    return
  }
  func.func @transform_0(%arg0: i32, %arg1: i32) -> (i32, i32) {
    %c0_i32 = arith.constant 0 : i32
    %c0_i32_0 = arith.constant 0 : i32
    return %arg1, %c0_i32 : i32, i32
  }
  func.func @transform_1(%arg0: i32, %arg1: i32) -> (i32, i32) {
    %c0_i32 = arith.constant 0 : i32
    %c0_i32_0 = arith.constant 0 : i32
    %c0_i32_1 = arith.constant 0 : i32
    return %c0_i32, %c0_i32_0 : i32, i32
  }
  func.func @transform_2(%arg0: i32, %arg1: i32) -> (i32, i32) {
    %c0_i32 = arith.constant 0 : i32
    %c0_i32_0 = arith.constant 0 : i32
    %c0_i32_1 = arith.constant 0 : i32
    return %c0_i32, %c0_i32_0 : i32, i32
  }
  func.func @transform_3(%arg0: i32, %arg1: i32) -> (i32, i32) {
    %c0_i32 = arith.constant 0 : i32
    %c0_i32_0 = arith.constant 0 : i32
    return %c0_i32, %arg0 : i32, i32
  }
  func.func @transform_4(%arg0: i32, %arg1: i32) -> (i32, i32) {
    %c0_i32 = arith.constant 0 : i32
    %c0_i32_0 = arith.constant 0 : i32
    return %c0_i32, %arg0 : i32, i32
  }
  func.func @transform_5(%arg0: i32, %arg1: i32) -> (i32, i32) {
    %c0_i32 = arith.constant 0 : i32
    return %arg1, %arg0 : i32, i32
  }
}

</mosaic_0001>

<bundles_post_ra>
// kernel: vit_forward.12
= control target key start
LH: loop header
LB: loop body
LE: loop exit
PB: predicated region body
PF: predicated region fallthrough
CT: control target
= control target key end

     0   :  { %v198_v0 = vmov 0   ;;  %vm122_vm0 = vcmask 523264   ;;  %s267_s1 = inlined_call_operand.vmem [shape: bf16[192,128], index: 1, kind: input, shape index: {}]   ;;  %s268_s0 = inlined_call_operand.vmem [shape: f32[8,192], index: 0, kind: input, shape index: {}]   ;;  %s269_s2 = inlined_call_operand.vmem [shape: f32[1,128], index: 2, kind: input, shape index: {}]   ;;  %s270_s3 = inlined_call_operand.vmem [shape: f32[8,128], index: 3, kind: output, shape index: {}]  }
   0x1   :  { %126 = vmatprep.subr.bf16.mxu0 %v198_v0  ;;  %v186_v1 = vld [vmem:[%s267_s1 + $0x38] sm:$0xff]   ;;  %v187_v2 = vld [vmem:[%s267_s1 + $0x30] sm:$0xff]   ;;  %v188_v3 = vld [vmem:[%s267_s1 + $0x28] sm:$0xff]  }
   0x2   :  { %127 = vmatpush1.bf16.msra.mxu0 %v186_v1  ;;  %v189_v4 = vld [vmem:[%s267_s1 + $0x20] sm:$0xff]   ;;  %v16_v5 = vld [vmem:[%s268_s0 + $0x8] sm:$0xff]  ;;  %v190_v7 = vld [vmem:[%s267_s1 + $0x18] sm:$0xff]  }
   0x3   :  { %128 = vmatprep.subr.bf16.mxu0 %v198_v0  ;;  %v18_v6 = vpack.c.bf16 %v16_v5, %v16_v5  ;;  %v191_v8 = vld [vmem:[%s267_s1 + $0x10] sm:$0xff]   ;;  %v192_v9 = vld [vmem:[%s267_s1 + $0x8] sm:$0xff]   ;;  %v193_v10 = vld [vmem:[%s267_s1] sm:$0xff]  }
   0x4   :  { %v194_v11 = vld [vmem:[%s267_s1 + $0x58] sm:$0xff]   ;;  %v195_v12 = vld [vmem:[%s267_s1 + $0x50] sm:$0xff]   ;;  %v196_v13 = vld [vmem:[%s267_s1 + $0x48] sm:$0xff]  }
   0x5   :  { %184 = vmatprep.mubr.msk.bf16.mxu0 %vm122_vm0, %v18_v6  ;;  %v197_v14 = vld [vmem:[%s267_s1 + $0x40] sm:$0xff]  }
   0x6   :  { %129 = vmatpush1.bf16.msra.mxu0 %v187_v2  ;;  %v15_v15 = vld [vmem:[%s268_s0] sm:$0xff] }
   0x7   :  { %130 = vmatprep.subr.bf16.mxu0 %v198_v0  ;;  %v17_v16 = vpack.c.bf16 %v15_v15, %v15_v15  ;;  %v171_v17 = vld [vmem:[%s269_s2] ss:$0 sm:$0xff] }
   0xa   :  { %131 = vmatpush1.bf16.msra.mxu0 %v188_v3 }
   0xb   :  { %132 = vmatprep.subr.bf16.mxu0 %v198_v0 }
   0xe   :  { %133 = vmatpush1.bf16.msra.mxu0 %v189_v4 }
   0xf   :  { %134 = vmatprep.subr.bf16.mxu0 %v198_v0 }
  0x12   :  { %135 = vmatpush1.bf16.msra.mxu0 %v190_v7 }
  0x13   :  { %136 = vmatprep.subr.bf16.mxu0 %v198_v0 }
  0x16   :  { %137 = vmatpush1.bf16.msra.mxu0 %v191_v8 }
  0x17   :  { %138 = vmatprep.subr.bf16.mxu0 %v198_v0 }
  0x1a   :  { %139 = vmatpush1.bf16.msra.mxu0 %v192_v9 }
  0x1b   :  { %140 = vmatprep.subr.bf16.mxu0 %v198_v0 }
  0x1e   :  { %141 = vmatpush1.bf16.msra.mxu0 %v193_v10 }
  0x1f   :  { %150 = vmatprep.subr.bf16.mxu0 %v198_v0 }
  0x22   :  { %151 = vmatpush2.bf16.msra.mxu0 %v194_v11 }
  0x23   :  { %152 = vmatprep.subr.bf16.mxu0 %v198_v0 }
  0x26   :  { %153 = vmatpush2.bf16.msra.mxu0 %v195_v12 }
  0x27   :  { %154 = vmatprep.subr.bf16.mxu0 %v198_v0 }
  0x2a   :  { %155 = vmatpush2.bf16.msra.mxu0 %v196_v13 }
  0x2b   :  { %156 = vmatprep.subr.bf16.mxu0 %v198_v0 }
  0x2e   :  { %157 = vmatpush2.bf16.msra.mxu0 %v197_v14 }
  0x31   :  { %159 = vmatmul.mubr.bf16.vlgmr.msra.gmra.mxu0 %v17_v16 }
  0xf1   :  { %v160_v18 = vpop.f32.mrf.mxu0 }
  0xf2   :  { %v161_v19 = vadd.f32 %v171_v17, %v160_v18 }
  0xf3   :  { %v162_v20 = vpop.f32.mrf.mxu0 }
  0xf4   :  { %166 = vst [vmem:[%s270_s3] sm:$0xff] %v161_v19 }
  0xf5   :  { %v163_v21 = vpop.f32.mrf.mxu0 }
  0xf7   :  { %v164_v22 = vpop.f32.mrf.mxu0 }

// kernel: vit_forward.15
= control target key start
LH: loop header
LB: loop body
LE: loop exit
PB: predicated region body
PF: predicated region fallthrough
CT: control target
= control target key end

     0   :  { %v191_v0 = vmov 0.0   ;;  %vm192_vm0 = vmmov 0   ;;  %s263_s1 = inlined_call_operand.vmem [shape: bf16[128,128], index: 1, kind: input, shape index: {}]   ;;  %s264_s0 = inlined_call_operand.vmem [shape: f32[16,128], index: 0, kind: input, shape index: {}]   ;;  %s265_s2 = inlined_call_operand.vmem [shape: f32[1,128], index: 2, kind: input, shape index: {}]   ;;  %s266_s3 = inlined_call_operand.vmem [shape: f32[16,128], index: 3, kind: input, shape index: {}]   ;;  %s267_s4 = inlined_call_operand.vmem [shape: f32[16,128], index: 4, kind: output, shape index: {}]  }
   0x1   :  { %161 = vmatprep.subr.bf16.mxu0 %v191_v0  ;;  %v183_v1 = vld [vmem:[%s263_s1 + $0x38] sm:$0xff]   ;;  %177 = vmatprep.mubr.msk.bf16.mxu0 %vm192_vm0, %v191_v0  ;;  %v184_v2 = vld [vmem:[%s263_s1 + $0x30] sm:$0xff]   ;;  %v185_v3 = vld [vmem:[%s263_s1 + $0x28] sm:$0xff]  }
   0x2   :  { %162 = vmatpush3.bf16.msra.mxu0 %v183_v1  ;;  %v186_v4 = vld [vmem:[%s263_s1 + $0x20] sm:$0xff]   ;;  %v187_v5 = vld [vmem:[%s263_s1 + $0x18] sm:$0xff]   ;;  %v188_v6 = vld [vmem:[%s263_s1 + $0x10] sm:$0xff]  }
   0x3   :  { %163 = vmatprep.subr.bf16.mxu0 %v191_v0  ;;  %v189_v7 = vld [vmem:[%s263_s1 + $0x8] sm:$0xff]   ;;  %v190_v8 = vld [vmem:[%s263_s1] sm:$0xff]  }
   0x4   :  { %v18_v9 = vld [vmem:[%s264_s0] sm:$0xff]  ;;  %v19_v10 = vld [vmem:[%s264_s0 + $0x8] sm:$0xff] }
   0x5   :  { %v20_v11 = vpack.c.bf16 %v19_v10, %v18_v9  ;;  %v143_v12 = vld [vmem:[%s265_s2] ss:$0 sm:$0xff]  ;;  %v134_v19 = vld [vmem:[%s266_s3 + $0x8] sm:$0xff] }
   0x6   :  { %164 = vmatpush3.bf16.msra.mxu0 %v184_v2  ;;  %v133_v14 = vld [vmem:[%s266_s3] sm:$0xff] }
   0x7   :  { %165 = vmatprep.subr.bf16.mxu0 %v191_v0 }
   0xa   :  { %166 = vmatpush3.bf16.msra.mxu0 %v185_v3 }
   0xb   :  { %167 = vmatprep.subr.bf16.mxu0 %v191_v0 }
   0xe   :  { %168 = vmatpush3.bf16.msra.mxu0 %v186_v4 }
   0xf   :  { %169 = vmatprep.subr.bf16.mxu0 %v191_v0 }
  0x12   :  { %170 = vmatpush3.bf16.msra.mxu0 %v187_v5 }
  0x13   :  { %171 = vmatprep.subr.bf16.mxu0 %v191_v0 }
  0x16   :  { %172 = vmatpush3.bf16.msra.mxu0 %v188_v6 }
  0x17   :  { %173 = vmatprep.subr.bf16.mxu0 %v191_v0 }
  0x1a   :  { %174 = vmatpush3.bf16.msra.mxu0 %v189_v7 }
  0x1b   :  { %175 = vmatprep.subr.bf16.mxu0 %v191_v0 }
  0x1e   :  { %176 = vmatpush3.bf16.msra.mxu0 %v190_v8 }
  0x21   :  { %178 = vmatmul.mubr.bf16.vlgmr.msra.gmra.mxu0 %v20_v11 }
  0xe1   :  { %v126_v13 = vpop.f32.mrf.mxu0 }
  0xe2   :  { %v127_v15 = vadd.f32 %v143_v12, %v126_v13 }
  0xe3   :  { %v179_v16 = vpop.f32.mrf.mxu0 }
  0xe4   :  { %v135_v17 = vadd.f32 %v133_v14, %v127_v15 }
  0xe5   :  { %v129_v18 = vpop.f32.mrf.mxu0 }
  0xe6   :  { %137 = vst [vmem:[%s267_s4] sm:$0xff] %v135_v17  ;;  %v130_v20 = vadd.f32 %v143_v12, %v129_v18 }
  0xe7   :  { %v180_v21 = vpop.f32.mrf.mxu0 }
  0xe8   :  { %v136_v22 = vadd.f32 %v134_v19, %v130_v20 }
  0xea   :  { %138 = vst [vmem:[%s267_s4 + $0x8] sm:$0xff] %v136_v22 }

// kernel: vit_forward.13
= control target key start
LH: loop header
LB: loop body
LE: loop exit
PB: predicated region body
PF: predicated region fallthrough
CT: control target
= control target key end

     0   :  { %v410_v3 = vmov 0.0   ;;  %v411_v27 = vmov 0   ;;  %vm412_vm0 = vmmov 0   ;;  %s559_s0 = inlined_call_operand.vmem [shape: f32[16,128], index: 0, kind: input, shape index: {}]   ;;  %s560_s3 = inlined_call_operand.vmem [shape: bf16[128,384], index: 3, kind: input, shape index: {}]   ;;  %s561_s1 = inlined_call_operand.vmem [shape: f32[1,128], index: 1, kind: input, shape index: {}]   ;;  %s562_s2 = inlined_call_operand.vmem [shape: f32[1,128], index: 2, kind: input, shape index: {}]   ;;  %s563_s4 = inlined_call_operand.vmem [shape: f32[16,384], index: 4, kind: output, shape index: {}]  }
   0x1   :  { %v18_v0 = vld [vmem:[%s559_s0] sm:$0xff]  ;;  %v19_v1 = vld [vmem:[%s559_s0 + $0x8] sm:$0xff]  ;;  %351 = vmatprep.subr.bf16.mxu1 %v410_v3  ;;  %v377_v5 = vld [vmem:[%s560_s3 + $0xb0] ss:$12 sps:$4 sm:$0xff]   ;;  %254 = vmatprep.mubr.bf16.mxu0 %v411_v27 }
   0x2   :  { %20 = vadd.xlane.f32.xlu0 %v18_v0  ;;  %v374_v2 = vld [vmem:[%s560_s3 + $0xac] ss:$12 sps:$4 sm:$0xff]   ;;  %v376_v4 = vld [vmem:[%s560_s3 + $0xa8] ss:$12 sps:$4 sm:$0xff]   ;;  %352 = vmatpush3.bf16.msra.mxu1 %v377_v5  ;;  %v380_v15 = vld [vmem:[%s560_s3 + $0x90] ss:$12 sps:$4 sm:$0xff]  }
   0x3   :  { %222 = vmatprep.subr.bf16.mxu0 %v374_v2  ;;  %353 = vmatprep.subr.bf16.mxu1 %v410_v3  ;;  %v378_v14 = vld [vmem:[%s560_s3 + $0x94] ss:$12 sps:$4 sm:$0xff]   ;;  %v381_v16 = vld [vmem:[%s560_s3 + $0x98] ss:$12 sps:$4 sm:$0xff]   ;;  %v382_v17 = vld [vmem:[%s560_s3 + $0x7c] ss:$12 sps:$4 sm:$0xff]  }
   0x4   :  { %223 = vmatpush1.bf16.msra.mxu0 %v376_v4  ;;  %v384_v18 = vld [vmem:[%s560_s3 + $0x78] ss:$12 sps:$4 sm:$0xff]   ;;  %v385_v19 = vld [vmem:[%s560_s3 + $0x80] ss:$12 sps:$4 sm:$0xff]   ;;  %v389_v22 = vld [vmem:[%s560_s3 + $0x68] ss:$12 sps:$4 sm:$0xff]   ;;  %367 = vmatprep.mubr.msk.bf16.mxu1 %vm412_vm0, %v410_v3 }
   0x5   :  { %224 = vmatprep.subr.bf16.mxu0 %v378_v14  ;;  %v386_v20 = vld [vmem:[%s560_s3 + $0x64] ss:$12 sps:$4 sm:$0xff]   ;;  %v388_v21 = vld [vmem:[%s560_s3 + $0x60] ss:$12 sps:$4 sm:$0xff]   ;;  %v392_v24 = vld [vmem:[%s560_s3 + $0x48] ss:$12 sps:$4 sm:$0xff]  }
   0x6   :  { %22 = vadd.xlane.f32.xlu0 %v19_v1  ;;  %354 = vmatpush3.bf16.msra.mxu1 %v381_v16  ;;  %v390_v23 = vld [vmem:[%s560_s3 + $0x4c] ss:$12 sps:$4 sm:$0xff]   ;;  %v393_v25 = vld [vmem:[%s560_s3 + $0x50] ss:$12 sps:$4 sm:$0xff]   ;;  %v394_v26 = vld [vmem:[%s560_s3 + $0x34] ss:$12 sps:$4 sm:$0xff]  }
   0x7   :  { %355 = vmatprep.subr.bf16.mxu1 %v410_v3  ;;  %v396_v28 = vld [vmem:[%s560_s3 + $0x30] ss:$12 sps:$4 sm:$0xff]   ;;  %v397_v29 = vld [vmem:[%s560_s3 + $0x38] ss:$12 sps:$4 sm:$0xff]   ;;  %v401_v32 = vld [vmem:[%s560_s3 + $0x20] ss:$12 sps:$4 sm:$0xff]  }
   0x8   :  { %225 = vmatpush1.bf16.msra.mxu0 %v380_v15  ;;  %v398_v30 = vld [vmem:[%s560_s3 + $0x1c] ss:$12 sps:$4 sm:$0xff]   ;;  %v400_v31 = vld [vmem:[%s560_s3 + $0x18] ss:$12 sps:$4 sm:$0xff]   ;;  %v404_v34 = vld [vmem:[%s560_s3] ss:$12 sps:$4 sm:$0xff]  }
   0x9   :  { %226 = vmatprep.subr.bf16.mxu0 %v382_v17  ;;  %v402_v33 = vld [vmem:[%s560_s3 + $0x4] ss:$12 sps:$4 sm:$0xff]   ;;  %v405_v35 = vld [vmem:[%s560_s3 + $0x8] ss:$12 sps:$4 sm:$0xff]   ;;  %v316_v44 = vld [vmem:[%s561_s1] ss:$0 sm:$0xff] }
   0xa   :  { %356 = vmatpush3.bf16.msra.mxu1 %v385_v19  ;;  %v317_v48 = vld [vmem:[%s562_s2] ss:$0 sm:$0xff] }
   0xb   :  { %357 = vmatprep.subr.bf16.mxu1 %v410_v3 }
   0xc   :  { %227 = vmatpush1.bf16.msra.mxu0 %v384_v18 }
   0xd   :  { %228 = vmatprep.subr.bf16.mxu0 %v386_v20 }
   0xe   :  { %358 = vmatpush3.bf16.msra.mxu1 %v389_v22 }
   0xf   :  { %359 = vmatprep.subr.bf16.mxu1 %v410_v3 }
  0x10   :  { %229 = vmatpush1.bf16.msra.mxu0 %v388_v21 }
  0x11   :  { %230 = vmatprep.subr.bf16.mxu0 %v390_v23 }
  0x12   :  { %360 = vmatpush3.bf16.msra.mxu1 %v393_v25 }
  0x13   :  { %361 = vmatprep.subr.bf16.mxu1 %v410_v3 }
  0x14   :  { %231 = vmatpush1.bf16.msra.mxu0 %v392_v24 }
  0x15   :  { %232 = vmatprep.subr.bf16.mxu0 %v394_v26 }
  0x16   :  { %362 = vmatpush3.bf16.msra.mxu1 %v397_v29 }
  0x17   :  { %363 = vmatprep.subr.bf16.mxu1 %v410_v3 }
  0x18   :  { %233 = vmatpush1.bf16.msra.mxu0 %v396_v28 }
  0x19   :  { %234 = vmatprep.subr.bf16.mxu0 %v398_v30 }
  0x1a   :  { %364 = vmatpush3.bf16.msra.mxu1 %v401_v32 }
  0x1b   :  { %365 = vmatprep.subr.bf16.mxu1 %v410_v3 }
  0x1c   :  { %235 = vmatpush1.bf16.msra.mxu0 %v400_v31 }
  0x1d   :  { %236 = vmatprep.subr.bf16.mxu0 %v402_v33 }
  0x1e   :  { %366 = vmatpush3.bf16.msra.mxu1 %v405_v35 }
  0x20   :  { %237 = vmatpush1.bf16.msra.mxu0 %v404_v34 }
  0x8b   :  { %v21_v6 = vpop.xlane.xlu0 %20 }
  0x8c   :  { %v25_v7 = vmul.f32 0.0078125, %v21_v6 }
  0x8e   :  { %v455_v8 = vsub.f32 %v18_v0, %v25_v7 }
  0x8f   :  { %v23_v9 = vpop.xlane.xlu0 %22 }
  0x90   :  { %v26_v10 = vmul.f32 0.0078125, %v23_v9  ;;  %v29_v11 = vmul.f32 %v455_v8, %v455_v8 }
  0x92   :  { %v459_v12 = vsub.f32 %v19_v1, %v26_v10  ;;  %31 = vadd.xlane.f32.xlu1 %v29_v11 }
  0x94   :  { %v30_v13 = vmul.f32 %v459_v12, %v459_v12 }
  0x96   :  { %33 = vadd.xlane.f32.xlu1 %v30_v13 }
 0x11b   :  { %v32_v36 = vpop.xlane.xlu1 %31 }
 0x11c   :  { %v35_v37 = vmul.f32 0.0078125, %v32_v36 }
 0x11e   :  { %v37_v38 = vadd.f32 1e-05, %v35_v37 }
 0x11f   :  { %v34_v39 = vpop.xlane.xlu1 %33 }
 0x120   :  { %406 = vrsqrt.f32 %v37_v38  ;;  %v36_v40 = vmul.f32 0.0078125, %v34_v39 }
 0x122   :  { %v38_v41 = vadd.f32 1e-05, %v36_v40 }
 0x124   :  { %408 = vrsqrt.f32 %v38_v41 }
 0x12d   :  { %v407_v42 = vpop.eup %406 }
 0x12e   :  { %v41_v43 = vmul.f32 %v407_v42, %v455_v8 }
 0x130   :  { %v50_v47 = vmul.f32 %v316_v44, %v41_v43 }
 0x131   :  { %v409_v45 = vpop.eup %408 }
 0x132   :  { %v42_v46 = vmul.f32 %v409_v45, %v459_v12  ;;  %v59_v50 = vadd.f32 %v317_v48, %v50_v47 }
 0x134   :  { %v51_v49 = vmul.f32 %v316_v44, %v42_v46 }
 0x136   :  { %v60_v51 = vadd.f32 %v317_v48, %v51_v49 }
 0x138   :  { %v61_v52 = vpack.c.bf16 %v60_v51, %v59_v50 }
 0x13a   :  { %255 = vmatmul.mubr.bf16.vlgmr.msra.gmra.mxu0 %v61_v52  ;;  %368 = vmatmul.mubr.bf16.vlgmr.msra.gmra.mxu1 %v61_v52 }
 0x1fa   :  { %v256_v53 = vpop.f32.mrf.mxu0  ;;  %v299_v54 = vpop.f32.mrf.mxu1 }
 0x1fb   :  { %306 = vst [vmem:[%s563_s4] sm:$0xff] %v256_v53  ;;  %308 = vst [vmem:[%s563_s4 + $0x10] sm:$0xff] %v299_v54 }
 0x1fc   :  { %v258_v55 = vpop.f32.mrf.mxu0  ;;  %v369_v56 = vpop.f32.mrf.mxu1 }
 0x1fd   :  { %307 = vst [vmem:[%s563_s4 + $0x8] sm:$0xff] %v258_v55 }
 0x1fe   :  { %v260_v57 = vpop.f32.mrf.mxu0  ;;  %v302_v58 = vpop.f32.mrf.mxu1 }
 0x1ff   :  { %309 = vst [vmem:[%s563_s4 + $0x18] sm:$0xff] %v260_v57  ;;  %311 = vst [vmem:[%s563_s4 + $0x28] sm:$0xff] %v302_v58 }
 0x200   :  { %v262_v59 = vpop.f32.mrf.mxu0  ;;  %v370_v60 = vpop.f32.mrf.mxu1 }
 0x201   :  { %310 = vst [vmem:[%s563_s4 + $0x20] sm:$0xff] %v262_v59 }

// kernel: vit_forward.14
= control target key start
LH: loop header
LB: loop body
LE: loop exit
PB: predicated region body
PF: predicated region fallthrough
CT: control target
= control target key end

     0   :  { %s774_s6 = smov 0   ;;  %s872_s0 = inlined_call_operand.vmem [shape: f32[2,5,384], index: 0, kind: input, shape index: {}]   ;;  %s873_s1 = inlined_call_operand.vmem [shape: f32[2,5,128], index: 1, kind: output, shape index: {}]  }
   0x1 LB: > { %s638_s7 = sadd.s32 4294967295, %s756_s6   ;;  %p642_p0 = scmp.ge.s32.totalorder %s756_s6, 1  ;;  %s756_s6 = sphi %s774_s6, %s11_s6  }
   0x2   : > { %p87_p1 = scmp.lt.s32.totalorder %s756_s6, 3 }
   0x4   : > { %p88_p2 = pnand %p642_p0, %p87_p1 }
   0x5   : > { %p106_p3 = scmp.lt.s32.totalorder (!%p88_p2), %s638_s7, 1  ;;  %s760_s12 = smov (!%p88_p2), 96  }
   0x6   : > { %91 = sbr.rel (%p88_p2) target bundleno = 1411 (0x583), region = 24  ;;  %s761_s13 = smov (!%p88_p2), 64  }
   0x7   : > { %s762_s14 = smov (!%p88_p2), 32  }
   0xb   : > { %v758_v0 = vmov 0.0   ;;  %vm759_vm0 = vmmov 0   ;;  %s875_s7 = smov (!%p106_p3, %s638_s7), 1  ;;  %vm122_vm1 = vcmask 261120   ;;  %vm169_vm2 = vcmask 36864  }
   0xc   : > { %671 = vmatprep.subr.bf16.mxu0 %v758_v0  ;;  %673 = vmatprep.mubr.msk.bf16.mxu0 %vm759_vm0, %v758_v0  ;;  %s719_s8 = smul.u32 24, %s875_s7  ;;  %vm187_vm3 = vcmask 1041408   ;;  %vm188_vm4 = vcmask 1042432   ;;  %v763_v19 = vmov 65535   ;;  %vm183_vm5 = vcmask 39936   ;;  %s644_s15 = sshll.u32 %s875_s7, 3 }
   0xd   : > { %677 = vmatprep.subr.bf16.mxu1 %v758_v0  ;;  %679 = vmatprep.mubr.msk.bf16.mxu1 %vm759_vm0, %v758_v0  ;;  %v189_v20 = vsel %vm187_vm3, 4294967295, %v763_v19  ;;  %vm580_vm6 = vcmask 523264   ;;  %vm582_vm7 = vcmask 785408   ;;  %s114_s18 = scalar_lea.vmem %s873_s1, %s644_s15 }
   0xe   : > { %s794_s11 = scalar_lea.vmem %s872_s0, %s719_s8  ;;  %v813_v21 = vsel %vm188_vm4, %v189_v20, 0 }
   0xf   : > { %v118_v1 = vld [vmem:[%s794_s11 + $0x8] sm:$0x1f]  ;;  %v116_v2 = vld [vmem:[%s794_s11] sm:$0x1f]  ;;  %v119_v17 = vld [vmem:[%s794_s11 + $0x10] sm:$0x1f] }
  0x10   : > { %v121_v3 = vpack.c.bf16 %v118_v1, %v118_v1  ;;  %v117_v5 = vmul.f32 0.17677669, %v116_v2  ;;  %v811_v18 = vpack.c.bf16 %v119_v17, %v119_v17 }
  0x12   : > { %v127_v4 = vsel %vm122_vm1, %v121_v3, 0  ;;  %v120_v6 = vpack.c.bf16 %v117_v5, %v117_v5  ;;  %238 = vrot.lane.b32.xlu1 %v121_v3, %s760_s12  ;;  %v192_v22 = vand.u32 %v813_v21, %v811_v18 }
  0x13   : > { %672 = vmatpush3.bf16.xpose.msra.mxu0 %v127_v4 }
  0x14   : > { %689 = vmatprep.subr.bf16.mxu0 %v758_v0  ;;  %678 = vmatpush3.bf16.msra.mxu1 %v192_v22 }
  0x15   : > { %683 = vmatprep.subr.bf16.mxu1 %v758_v0 }
  0x16   : > { %235 = vrot.lane.b32.xlu1 %v120_v6, %s760_s12 }
  0x1a   : > { %674 = vmatmul.mubr.msk.bf16.vlgmr.msra.gmra.mxu0 %vm122_vm1, %v120_v6  ;;  %347 = vrot.lane.b32.xlu1 %v120_v6, %s761_s13 }
  0x1b   : > { %691 = vmatprep.mubr.msk.bf16.mxu0 %vm759_vm0, %v758_v0 }
  0x1e   : > { %459 = vrot.lane.b32.xlu1 %v121_v3, %s762_s14 }
  0x22   : > { %457 = vrot.lane.b32.xlu1 %v120_v6, %s762_s14 }
  0x84   : > { %v239_v25 = vpop.permute.xlu1 %238 }
  0x85   : > { %v244_v27 = vsel %vm122_vm1, %v239_v25, 0 }
  0x88   : > { %v236_v29 = vpop.permute.xlu1 %235 }
  0x8c   : > { %v348_v31 = vpop.permute.xlu1 %347 }
  0x90   : > { %v460_v33 = vpop.permute.xlu1 %459 }
  0x91   : > { %v465_v34 = vsel %vm122_vm1, %v460_v33, 0 }
  0x94   : > { %v458_v35 = vpop.permute.xlu1 %457 }
  0xda   : > { %v163_v7 = vpop.f32.mrf.mxu0 }
  0xdb   : > { %v170_v8 = vsel %vm169_vm2, %v163_v7, -inf }
  0xdc   : > { %171 = vmax.xlane.f32.xlu0 %v170_v8  ;;  %v675_v9 = vpop.f32.mrf.mxu0 }
  0xde   : > { %v166_v10 = vpop.f32.mrf.mxu0 }
  0xe0   : > { %v676_v11 = vpop.f32.mrf.mxu0 }
 0x165   : > { %v172_v12 = vpop.xlane.xlu0 %171 }
 0x166   : > { %v173_v13 = vsub.f32 %v163_v7, %v172_v12 }
 0x168   : > { %v174_v14 = vmul.f32 1.442695, %v173_v13 }
 0x16a   : > { %734 = vpow2.f32 %v174_v14 }
 0x177   : > { %v735_v15 = vpop.eup %734 }
 0x178   : > { %v176_v16 = vsel %vm169_vm2, %v735_v15, 0.0 }
 0x179   : > { %177 = vadd.xlane.f32.xlu0 %v176_v16 }
 0x18f   : > { %349 = vrot.lane.b32.xlu0 %v121_v3, %s761_s13 }
 0x202   : > { %v178_v23 = vpop.xlane.xlu0 %177 }
 0x203   : > { %736 = vrcp.f32 %v178_v23 }
 0x206   : > { %v350_v30 = vpop.permute.xlu0 %349 }
 0x207   : > { %v355_v32 = vsel %vm122_vm1, %v350_v30, 0 }
 0x210   : > { %v737_v24 = vpop.eup %736 }
 0x211   : > { %v180_v26 = vmul.f32 %v737_v24, %v735_v15 }
 0x213   : > { %v181_v28 = vpack.c.bf16 %v180_v26, %v180_v26 }
 0x215   : > { %680 = vmatmul.mubr.msk.bf16.vlgmr.msra.gmra.mxu1 %vm183_vm5, %v181_v28 }
 0x216   : > { %684 = vmatpush3.bf16.xpose.msra.mxu1 %v244_v27  ;;  %685 = vmatprep.mubr.msk.bf16.mxu1 %vm759_vm0, %v758_v0 }
 0x217   : > { %695 = vmatprep.subr.bf16.mxu1 %v758_v0 }
 0x21d   : > { %686 = vmatmul.mubr.msk.bf16.vlgmr.msra.gmra.mxu1 %vm122_vm1, %v236_v29 }
 0x21e   : > { %696 = vmatpush3.bf16.xpose.msra.mxu1 %v355_v32  ;;  %697 = vmatprep.mubr.msk.bf16.mxu1 %vm759_vm0, %v758_v0 }
 0x21f   : > { %707 = vmatprep.subr.bf16.mxu1 %v758_v0 }
 0x225   : > { %698 = vmatmul.mubr.msk.bf16.vlgmr.msra.gmra.mxu1 %vm122_vm1, %v348_v31 }
 0x226   : > { %708 = vmatpush3.bf16.xpose.msra.mxu1 %v465_v34  ;;  %709 = vmatprep.mubr.msk.bf16.mxu1 %vm759_vm0, %v758_v0 }
 0x22d   : > { %710 = vmatmul.mubr.msk.bf16.vlgmr.msra.gmra.mxu1 %vm122_vm1, %v458_v35 }
 0x2d5   : > { %v834_v36 = vpop.f32.mrf.mxu1 }
 0x2d7   : > { %v681_v37 = vpop.f32.mrf.mxu1 }
 0x2d9   : > { %v231_v38 = vpop.f32.mrf.mxu1 }
 0x2db   : > { %v682_v39 = vpop.f32.mrf.mxu1 }
 0x2dd   : > { %v280_v40 = vpop.f32.mrf.mxu1 }
 0x2de   : > { %v286_v41 = vsel %vm169_vm2, %v280_v40, -inf }
 0x2df   : > { %287 = vmax.xlane.f32.xlu1 %v286_v41  ;;  %v687_v42 = vpop.f32.mrf.mxu1 }
 0x2e1   : > { %v283_v43 = vpop.f32.mrf.mxu1 }
 0x2e3   : > { %v688_v44 = vpop.f32.mrf.mxu1 }
 0x2e5   : > { %v391_v45 = vpop.f32.mrf.mxu1 }
 0x2e6   : > { %v397_v46 = vsel %vm169_vm2, %v391_v45, -inf }
 0x2e7   : > { %398 = vmax.xlane.f32.xlu0 %v397_v46  ;;  %v699_v47 = vpop.f32.mrf.mxu1 }
 0x2e9   : > { %v394_v48 = vpop.f32.mrf.mxu1 }
 0x2eb   : > { %v700_v49 = vpop.f32.mrf.mxu1 }
 0x2ed   : > { %v501_v50 = vpop.f32.mrf.mxu1 }
 0x2ee   : > { %v507_v51 = vsel %vm169_vm2, %v501_v50, -inf }
 0x2ef   : > { %508 = vmax.xlane.f32.xlu1 %v507_v51  ;;  %v711_v52 = vpop.f32.mrf.mxu1 }
 0x2f1   : > { %v504_v53 = vpop.f32.mrf.mxu1 }
 0x2f3   : > { %v712_v54 = vpop.f32.mrf.mxu1 }
 0x368   : > { %v288_v55 = vpop.xlane.xlu1 %287 }
 0x369   : > { %v289_v56 = vsub.f32 %v280_v40, %v288_v55 }
 0x36b   : > { %v290_v57 = vmul.f32 1.442695, %v289_v56 }
 0x36d   : > { %738 = vpow2.f32 %v290_v57 }
 0x370   : > { %v399_v58 = vpop.xlane.xlu0 %398 }
 0x371   : > { %v400_v59 = vsub.f32 %v391_v45, %v399_v58 }
 0x373   : > { %v401_v60 = vmul.f32 1.442695, %v400_v59 }
 0x375   : > { %740 = vpow2.f32 %v401_v60 }
 0x378   : > { %v509_v2 = vpop.xlane.xlu1 %508 }
 0x379   : > { %v510_v3 = vsub.f32 %v501_v50, %v509_v2 }
 0x37a   : > { %v739_v61 = vpop.eup %738 }
 0x37b   : > { %v292_v62 = vsel %vm169_vm2, %v739_v61, 0.0  ;;  %v511_v4 = vmul.f32 1.442695, %v510_v3 }
 0x37c   : > { %293 = vadd.xlane.f32.xlu1 %v292_v62 }
 0x37d   : > { %742 = vpow2.f32 %v511_v4 }
 0x382   : > { %v741_v63 = vpop.eup %740 }
 0x383   : > { %v403_v1 = vsel %vm169_vm2, %v741_v63, 0.0 }
 0x384   : > { %404 = vadd.xlane.f32.xlu0 %v403_v1 }
 0x38a   : > { %v743_v5 = vpop.eup %742 }
 0x38b   : > { %v513_v6 = vsel %vm169_vm2, %v743_v5, 0.0 }
 0x38d   : > { %409 = vrot.lane.b32.xlu1 %v811_v18, %s761_s13 }
 0x39a   : > { %299 = vrot.lane.b32.xlu0 %v811_v18, %s760_s12 }
 0x3b1   : > { %514 = vadd.xlane.f32.xlu1 %v513_v6 }
 0x3c2   : > { %519 = vrot.lane.b32.xlu1 %v811_v18, %s762_s14 }
 0x405   : > { %v294_v7 = vpop.xlane.xlu1 %293 }
 0x406   : > { %744 = vrcp.f32 %v294_v7 }
 0x409   : > { %v410_v12 = vpop.permute.xlu1 %409 }
 0x40a   : > { %v415_v15 = vand.u32 %v410_v12, %v813_v21 }
 0x40d   : > { %v405_v8 = vpop.xlane.xlu0 %404 }
 0x40e   : > { %746 = vrcp.f32 %v405_v8 }
 0x411   : > { %v300_v9 = vpop.permute.xlu0 %299 }
 0x412   : > { %v305_v10 = vand.u32 %v300_v9, %v813_v21 }
 0x413   : > { %v745_v11 = vpop.eup %744 }
 0x414   : > { %690 = vmatpush3.bf16.msra.mxu0 %v305_v10  ;;  %v296_v13 = vmul.f32 %v745_v11, %v739_v61 }
 0x415   : > { %701 = vmatprep.subr.bf16.mxu0 %v758_v0 }
 0x416   : > { %v297_v14 = vpack.c.bf16 %v296_v13, %v296_v13 }
 0x418   : > { %692 = vmatmul.mubr.msk.bf16.vlgmr.msra.gmra.mxu0 %vm183_vm5, %v297_v14 }
 0x419   : > { %702 = vmatpush3.bf16.msra.mxu0 %v415_v15  ;;  %703 = vmatprep.mubr.msk.bf16.mxu0 %vm759_vm0, %v758_v0 }
 0x41a   : > { %713 = vmatprep.subr.bf16.mxu0 %v758_v0 }
 0x41b   : > { %v747_v16 = vpop.eup %746 }
 0x41c   : > { %v407_v17 = vmul.f32 %v747_v16, %v741_v63 }
 0x41e   : > { %v408_v18 = vpack.c.bf16 %v407_v17, %v407_v17 }
 0x420   : > { %704 = vmatmul.mubr.msk.bf16.vlgmr.msra.gmra.mxu0 %vm183_vm5, %v408_v18 }
 0x421   : > { %715 = vmatprep.mubr.msk.bf16.mxu0 %vm759_vm0, %v758_v0 }
 0x43a   : > { %v515_v19 = vpop.xlane.xlu1 %514 }
 0x43b   : > { %748 = vrcp.f32 %v515_v19 }
 0x43e   : > { %v520_v20 = vpop.permute.xlu1 %519 }
 0x43f   : > { %v525_v22 = vand.u32 %v520_v20, %v813_v21 }
 0x441   : > { %714 = vmatpush3.bf16.msra.mxu0 %v525_v22 }
 0x448   : > { %v749_v23 = vpop.eup %748 }
 0x449   : > { %v517_v24 = vmul.f32 %v749_v23, %v743_v5 }
 0x44b   : > { %v518_v25 = vpack.c.bf16 %v517_v24, %v517_v24 }
 0x44d   : > { %716 = vmatmul.mubr.msk.bf16.vlgmr.msra.gmra.mxu0 %vm183_vm5, %v518_v25 }
 0x4d8   : > { %v341_v26 = vpop.f32.mrf.mxu0 }
 0x4d9   : > { %568 = vrot.lane.b32.xlu0 %v341_v26, %s762_s14 }
 0x4da   : > { %v693_v27 = vpop.f32.mrf.mxu0 }
 0x4dc   : > { %v344_v28 = vpop.f32.mrf.mxu0 }
 0x4de   : > { %v694_v29 = vpop.f32.mrf.mxu0 }
 0x4e0   : > { %v451_v30 = vpop.f32.mrf.mxu0 }
 0x4e1   : > { %572 = vrot.lane.b32.xlu1 %v451_v30, %s761_s13 }
 0x4e2   : > { %v705_v0 = vpop.f32.mrf.mxu0 }
 0x4e4   : > { %v454_v31 = vpop.f32.mrf.mxu0 }
 0x4e6   : > { %v706_v32 = vpop.f32.mrf.mxu0 }
 0x50d   : > { %v561_v21 = vpop.f32.mrf.mxu0 }
 0x50e   : > { %576 = vrot.lane.b32.xlu0 %v561_v21, %s760_s12 }
 0x50f   : > { %v717_v33 = vpop.f32.mrf.mxu0 }
 0x511   : > { %v564_v34 = vpop.f32.mrf.mxu0 }
 0x513   : > { %v718_v35 = vpop.f32.mrf.mxu0 }
 0x54b   : > { %v569_v37 = vpop.permute.xlu0 %568 }
 0x54c   : > { %v579_v39 = vsel %vm122_vm1, %v834_v36, %v569_v37 }
 0x553   : > { %v573_v38 = vpop.permute.xlu1 %572 }
 0x554   : > { %v581_v40 = vsel %vm580_vm6, %v579_v39, %v573_v38 }
 0x580   : > { %v577_v41 = vpop.permute.xlu0 %576 }
 0x581   : > { %v583_v42 = vsel %vm582_vm7, %v581_v40, %v577_v41 }
 0x582   : > { %584 = vst [vmem:[%s114_s18] sm:$0x1f] %v583_v42 }
 0x583 PF: > { %s11_s6 = sadd.s32 1, %s756_s6  }
 0x584   : > { %p8_p4 = scmp.ge.s32.totalorder %s11_s6, 4  }
 0x586   :  { %10 = sbr.rel (!%p8_p4) target bundleno = 1 (0x1), region = 54 }

// kernel: vit_forward.16
= control target key start
LH: loop header
LB: loop body
LE: loop exit
PB: predicated region body
PF: predicated region fallthrough
CT: control target
= control target key end

     0   :  { %v395_v21 = vmov 0   ;;  %v83_v44 = vlaneseq  ;;  %s533_s0 = inlined_call_operand.vmem [shape: f32[16,128], index: 0, kind: input, shape index: {}]   ;;  %s534_s3 = inlined_call_operand.vmem [shape: bf16[128,256], index: 3, kind: input, shape index: {}]   ;;  %s535_s1 = inlined_call_operand.vmem [shape: f32[1,128], index: 1, kind: input, shape index: {}]   ;;  %s536_s2 = inlined_call_operand.vmem [shape: f32[1,128], index: 2, kind: input, shape index: {}]   ;;  %s537_s4 = inlined_call_operand.vmem [shape: f32[1,256], index: 4, kind: input, shape index: {}]   ;;  %s538_s5 = inlined_call_operand.vmem [shape: f32[16,256], index: 5, kind: output, shape index: {}]  }
   0x1   :  { %v21_v0 = vld [vmem:[%s533_s0] sm:$0xff]  ;;  %v22_v1 = vld [vmem:[%s533_s0 + $0x8] sm:$0xff]  ;;  %v351_v2 = vld [vmem:[%s534_s3 + $0x74] ss:$8 sps:$4 sm:$0xff]   ;;  %205 = vmatprep.mubr.bf16.mxu0 %v395_v21 }
   0x2   :  { %23 = vadd.xlane.f32.xlu0 %v21_v0  ;;  %v353_v3 = vld [vmem:[%s534_s3 + $0x70] ss:$8 sps:$4 sm:$0xff]   ;;  %173 = vmatprep.subr.bf16.mxu0 %v351_v2  ;;  %v354_v12 = vld [vmem:[%s534_s3 + $0x64] ss:$8 sps:$4 sm:$0xff]   ;;  %v356_v13 = vld [vmem:[%s534_s3 + $0x60] ss:$8 sps:$4 sm:$0xff]  }
   0x3   :  { %174 = vmatpush1.bf16.msra.mxu0 %v353_v3  ;;  %v357_v14 = vld [vmem:[%s534_s3 + $0x54] ss:$8 sps:$4 sm:$0xff]   ;;  %v359_v15 = vld [vmem:[%s534_s3 + $0x50] ss:$8 sps:$4 sm:$0xff]   ;;  %v360_v16 = vld [vmem:[%s534_s3 + $0x44] ss:$8 sps:$4 sm:$0xff]  }
   0x4   :  { %175 = vmatprep.subr.bf16.mxu0 %v354_v12  ;;  %v362_v17 = vld [vmem:[%s534_s3 + $0x40] ss:$8 sps:$4 sm:$0xff]   ;;  %v363_v18 = vld [vmem:[%s534_s3 + $0x34] ss:$8 sps:$4 sm:$0xff]   ;;  %v365_v19 = vld [vmem:[%s534_s3 + $0x30] ss:$8 sps:$4 sm:$0xff]  }
   0x5   :  { %v366_v20 = vld [vmem:[%s534_s3 + $0x24] ss:$8 sps:$4 sm:$0xff]   ;;  %v368_v22 = vld [vmem:[%s534_s3 + $0x20] ss:$8 sps:$4 sm:$0xff]   ;;  %v369_v23 = vld [vmem:[%s534_s3 + $0x14] ss:$8 sps:$4 sm:$0xff]  }
   0x6   :  { %25 = vadd.xlane.f32.xlu0 %v22_v1  ;;  %v371_v24 = vld [vmem:[%s534_s3 + $0x10] ss:$8 sps:$4 sm:$0xff]   ;;  %v372_v25 = vld [vmem:[%s534_s3 + $0x4] ss:$8 sps:$4 sm:$0xff]   ;;  %v374_v26 = vld [vmem:[%s534_s3] ss:$8 sps:$4 sm:$0xff]  }
   0x7   :  { %176 = vmatpush1.bf16.msra.mxu0 %v356_v13  ;;  %v332_v35 = vld [vmem:[%s535_s1] ss:$0 sm:$0xff]  ;;  %v84_v45 = vshrl.u32 %v83_v44, 7 }
   0x8   :  { %177 = vmatprep.subr.bf16.mxu0 %v357_v14  ;;  %v333_v39 = vld [vmem:[%s536_s2] ss:$0 sm:$0xff] }
   0x9   :  { %v85_v46 = vsub.s32 0, %v84_v45  ;;  %v81_v47 = vld [vmem:[%s537_s4] sm:$0x3]  ;;  %v89_v48 = vsub.s32 1, %v84_v45 }
   0xb   :  { %178 = vmatpush1.bf16.msra.mxu0 %v359_v15  ;;  %v86_v49 = vrot.slane %v81_v47, %v85_v46  ;;  %v90_v50 = vrot.slane %v81_v47, %v89_v48 }
   0xc   :  { %179 = vmatprep.subr.bf16.mxu0 %v360_v16 }
   0xf   :  { %180 = vmatpush1.bf16.msra.mxu0 %v362_v17 }
  0x10   :  { %181 = vmatprep.subr.bf16.mxu0 %v363_v18 }
  0x13   :  { %182 = vmatpush1.bf16.msra.mxu0 %v365_v19 }
  0x14   :  { %183 = vmatprep.subr.bf16.mxu0 %v366_v20 }
  0x17   :  { %184 = vmatpush1.bf16.msra.mxu0 %v368_v22 }
  0x18   :  { %185 = vmatprep.subr.bf16.mxu0 %v369_v23 }
  0x1b   :  { %186 = vmatpush1.bf16.msra.mxu0 %v371_v24 }
  0x1c   :  { %187 = vmatprep.subr.bf16.mxu0 %v372_v25 }
  0x1f   :  { %188 = vmatpush1.bf16.msra.mxu0 %v374_v26 }
  0x8b   :  { %v24_v4 = vpop.xlane.xlu0 %23 }
  0x8c   :  { %v28_v5 = vmul.f32 0.0078125, %v24_v4 }
  0x8e   :  { %v30_v6 = vsub.f32 %v21_v0, %v28_v5 }
  0x8f   :  { %v26_v7 = vpop.xlane.xlu0 %25 }
  0x90   :  { %v29_v8 = vmul.f32 0.0078125, %v26_v7  ;;  %v32_v9 = vmul.f32 %v30_v6, %v30_v6 }
  0x92   :  { %v31_v10 = vsub.f32 %v22_v1, %v29_v8  ;;  %34 = vadd.xlane.f32.xlu1 %v32_v9 }
  0x94   :  { %v33_v11 = vmul.f32 %v31_v10, %v31_v10 }
  0x96   :  { %36 = vadd.xlane.f32.xlu1 %v33_v11 }
 0x11b   :  { %v35_v27 = vpop.xlane.xlu1 %34 }
 0x11c   :  { %v38_v28 = vmul.f32 0.0078125, %v35_v27 }
 0x11e   :  { %v40_v29 = vadd.f32 1e-05, %v38_v28 }
 0x11f   :  { %v37_v30 = vpop.xlane.xlu1 %36 }
 0x120   :  { %375 = vrsqrt.f32 %v40_v29  ;;  %v39_v31 = vmul.f32 0.0078125, %v37_v30 }
 0x122   :  { %v41_v32 = vadd.f32 1e-05, %v39_v31 }
 0x124   :  { %377 = vrsqrt.f32 %v41_v32 }
 0x12d   :  { %v376_v33 = vpop.eup %375 }
 0x12e   :  { %v44_v34 = vmul.f32 %v376_v33, %v30_v6 }
 0x130   :  { %v53_v38 = vmul.f32 %v332_v35, %v44_v34 }
 0x131   :  { %v378_v36 = vpop.eup %377 }
 0x132   :  { %v45_v37 = vmul.f32 %v378_v36, %v31_v10  ;;  %v62_v41 = vadd.f32 %v333_v39, %v53_v38 }
 0x134   :  { %v54_v40 = vmul.f32 %v332_v35, %v45_v37 }
 0x136   :  { %v63_v42 = vadd.f32 %v333_v39, %v54_v40 }
 0x138   :  { %v64_v43 = vpack.c.bf16 %v63_v42, %v62_v41 }
 0x13a   :  { %206 = vmatmul.mubr.bf16.vlgmr.msra.gmra.mxu0 %v64_v43 }
 0x1fa   :  { %v207_v51 = vpop.f32.mrf.mxu0 }
 0x1fb   :  { %v489_v52 = vadd.f32 %v207_v51, %v86_v49 }
 0x1fc   :  { %v209_v53 = vpop.f32.mrf.mxu0 }
 0x1fd   :  { %v492_v54 = vmul.f32 0.70710677, %v489_v52  ;;  %v494_v55 = vadd.f32 %v209_v53, %v90_v50 }
 0x1fe   :  { %v211_v56 = vpop.f32.mrf.mxu0 }
 0x1ff   :  { %v224_v57 = vand.u32 2147483647, %v492_v54  ;;  %v498_v58 = vmul.f32 0.70710677, %v494_v55  ;;  %v500_v59 = vadd.f32 %v211_v56, %v86_v49  ;;  %vm304_vm0 = vcmp.ge.f32.partialorder %v492_v54, 0.0 }
 0x200   :  { %v213_v60 = vpop.f32.mrf.mxu0 }
 0x201   :  { %v228_v61 = vmul.f32 0.3275911, %v224_v57  ;;  %v225_v62 = vand.u32 2147483647, %v498_v58  ;;  %v504_v63 = vmul.f32 0.70710677, %v500_v59  ;;  %v506_v0 = vadd.f32 %v213_v60, %v90_v50 }
 0x202   :  { %v280_v11 = vsub.f32 0.0, %v224_v57  ;;  %vm305_vm1 = vcmp.ge.f32.partialorder %v498_v58, 0.0 }
 0x203   :  { %v232_v1 = vadd.f32 1.0, %v228_v61  ;;  %v229_v2 = vmul.f32 0.3275911, %v225_v62  ;;  %v226_v3 = vand.u32 2147483647, %v504_v63  ;;  %v281_v12 = vsub.f32 0.0, %v225_v62 }
 0x204   :  { %v510_v4 = vmul.f32 0.70710677, %v506_v0  ;;  %v284_v13 = vmul.f32 %v280_v11, %v224_v57  ;;  %vm306_vm2 = vcmp.ge.f32.partialorder %v504_v63, 0.0  ;;  %v219_v63 = vmul.f32 0.5, %v506_v0 }
 0x205   :  { %379 = vrcp.f32 %v232_v1  ;;  %v233_v5 = vadd.f32 1.0, %v229_v2  ;;  %v230_v6 = vmul.f32 0.3275911, %v226_v3  ;;  %v282_v14 = vsub.f32 0.0, %v226_v3 }
 0x206   :  { %v227_v7 = vand.u32 2147483647, %v510_v4  ;;  %v285_v16 = vmul.f32 %v281_v12, %v225_v62  ;;  %v288_v18 = vmul.f32 1.442695, %v284_v13  ;;  %vm307_vm3 = vcmp.ge.f32.partialorder %v510_v4, 0.0 }
 0x207   :  { %381 = vrcp.f32 %v233_v5  ;;  %v234_v8 = vadd.f32 1.0, %v230_v6  ;;  %v286_v20 = vmul.f32 %v282_v14, %v226_v3 }
 0x208   :  { %v231_v9 = vmul.f32 0.3275911, %v227_v7  ;;  %v283_v19 = vsub.f32 0.0, %v227_v7  ;;  %v290_v24 = vmul.f32 1.442695, %v285_v16 }
 0x209   :  { %383 = vrcp.f32 %v234_v8  ;;  %v292_v30 = vmul.f32 1.442695, %v286_v20 }
 0x20a   :  { %v235_v10 = vadd.f32 1.0, %v231_v9  ;;  %v287_v27 = vmul.f32 %v283_v19, %v227_v7 }
 0x20c   :  { %385 = vrcp.f32 %v235_v10  ;;  %v294_v37 = vmul.f32 1.442695, %v287_v27 }
 0x20d   :  { %387 = vpow2.f32 %v288_v18  ;;  %v216_v18 = vmul.f32 0.5, %v489_v52 }
 0x20e   :  { %389 = vpow2.f32 %v290_v24 }
 0x20f   :  { %391 = vpow2.f32 %v292_v30 }
 0x210   :  { %393 = vpow2.f32 %v294_v37 }
 0x212   :  { %v380_v15 = vpop.eup %379 }
 0x213   :  { %v244_v17 = vmul.f32 1.0614054, %v380_v15 }
 0x214   :  { %v382_v21 = vpop.eup %381 }
 0x215   :  { %v248_v22 = vadd.f32 -1.4531521, %v244_v17  ;;  %v245_v23 = vmul.f32 1.0614054, %v382_v21 }
 0x216   :  { %v384_v25 = vpop.eup %383 }
 0x217   :  { %v252_v26 = vmul.f32 %v380_v15, %v248_v22  ;;  %v249_v28 = vadd.f32 -1.4531521, %v245_v23  ;;  %v246_v29 = vmul.f32 1.0614054, %v384_v25 }
 0x219   :  { %v256_v31 = vadd.f32 1.4214138, %v252_v26  ;;  %v386_v32 = vpop.eup %385  ;;  %v253_v33 = vmul.f32 %v382_v21, %v249_v28  ;;  %v250_v34 = vadd.f32 -1.4531521, %v246_v29  ;;  %v217_v26 = vmul.f32 0.5, %v494_v55 }
 0x21a   :  { %v247_v36 = vmul.f32 1.0614054, %v386_v32  ;;  %v388_v57 = vpop.eup %387  ;;  %v218_v29 = vmul.f32 0.5, %v500_v59 }
 0x21b   :  { %v260_v35 = vmul.f32 %v380_v15, %v256_v31  ;;  %v257_v38 = vadd.f32 1.4214138, %v253_v33  ;;  %v254_v39 = vmul.f32 %v384_v25, %v250_v34  ;;  %v390_v5 = vpop.eup %389 }
 0x21c   :  { %v251_v41 = vadd.f32 -1.4531521, %v247_v36  ;;  %v392_v10 = vpop.eup %391 }
 0x21d   :  { %v264_v40 = vadd.f32 -0.28449672, %v260_v35  ;;  %v261_v42 = vmul.f32 %v382_v21, %v257_v38  ;;  %v258_v43 = vadd.f32 1.4214138, %v254_v39  ;;  %v394_v17 = vpop.eup %393 }
 0x21e   :  { %v255_v45 = vmul.f32 %v386_v32, %v251_v41 }
 0x21f   :  { %v268_v44 = vmul.f32 %v380_v15, %v264_v40  ;;  %v265_v46 = vadd.f32 -0.28449672, %v261_v42  ;;  %v262_v47 = vmul.f32 %v384_v25, %v258_v43 }
 0x220   :  { %v259_v49 = vadd.f32 1.4214138, %v255_v45 }
 0x221   :  { %v272_v48 = vadd.f32 0.2548296, %v268_v44  ;;  %v269_v50 = vmul.f32 %v382_v21, %v265_v46  ;;  %v266_v51 = vadd.f32 -0.28449672, %v262_v47 }
 0x222   :  { %v263_v56 = vmul.f32 %v386_v32, %v259_v49 }
 0x223   :  { %v276_v53 = vmul.f32 %v380_v15, %v272_v48  ;;  %v273_v60 = vadd.f32 0.2548296, %v269_v50  ;;  %v270_v61 = vmul.f32 %v384_v25, %v266_v51 }
 0x224   :  { %v267_v1 = vadd.f32 -0.28449672, %v263_v56 }
 0x225   :  { %v296_v62 = vmul.f32 %v388_v57, %v276_v53  ;;  %v277_v2 = vmul.f32 %v382_v21, %v273_v60  ;;  %v274_v3 = vadd.f32 0.2548296, %v270_v61 }
 0x226   :  { %v271_v7 = vmul.f32 %v386_v32, %v267_v1 }
 0x227   :  { %v300_v6 = vsub.f32 1.0, %v296_v62  ;;  %v297_v8 = vmul.f32 %v390_v5, %v277_v2  ;;  %v278_v9 = vmul.f32 %v384_v25, %v274_v3 }
 0x228   :  { %v275_v12 = vadd.f32 0.2548296, %v271_v7 }
 0x229   :  { %v308_v11 = vsub.f32 0.0, %v300_v6  ;;  %v301_v13 = vsub.f32 1.0, %v297_v8  ;;  %v298_v14 = vmul.f32 %v392_v10, %v278_v9 }
 0x22a   :  { %v279_v16 = vmul.f32 %v386_v32, %v275_v12 }
 0x22b   :  { %v312_v15 = vsel %vm304_vm0, %v300_v6, %v308_v11  ;;  %v309_v20 = vsub.f32 0.0, %v301_v13  ;;  %v302_v21 = vsub.f32 1.0, %v298_v14 }
 0x22c   :  { %v316_v19 = vadd.f32 1.0, %v312_v15  ;;  %v299_v22 = vmul.f32 %v394_v17, %v279_v16 }
 0x22d   :  { %v313_v24 = vsel %vm305_vm1, %v301_v13, %v309_v20  ;;  %v310_v25 = vsub.f32 0.0, %v302_v21 }
 0x22e   :  { %v320_v23 = vmul.f32 %v316_v19, %v216_v18  ;;  %v317_v27 = vadd.f32 1.0, %v313_v24  ;;  %v303_v54 = vsub.f32 1.0, %v299_v22 }
 0x22f   :  { %v314_v52 = vsel %vm306_vm2, %v302_v21, %v310_v25 }
 0x230   :  { %324 = vst [vmem:[%s538_s5] sm:$0xff] %v320_v23  ;;  %v321_v28 = vmul.f32 %v317_v27, %v217_v26  ;;  %v318_v30 = vadd.f32 1.0, %v314_v52  ;;  %v311_v58 = vsub.f32 0.0, %v303_v54 }
 0x232   :  { %325 = vst [vmem:[%s538_s5 + $0x8] sm:$0xff] %v321_v28  ;;  %v322_v55 = vmul.f32 %v318_v30, %v218_v29  ;;  %v315_v31 = vsel %vm307_vm3, %v303_v54, %v311_v58 }
 0x233   :  { %v319_v32 = vadd.f32 1.0, %v315_v31 }
 0x234   :  { %326 = vst [vmem:[%s538_s5 + $0x10] sm:$0xff] %v322_v55 }
 0x235   :  { %v323_v33 = vmul.f32 %v319_v32, %v219_v63 }
 0x237   :  { %327 = vst [vmem:[%s538_s5 + $0x18] sm:$0xff] %v323_v33 }

// kernel: vit_forward.17
= control target key start
LH: loop header
LB: loop body
LE: loop exit
PB: predicated region body
PF: predicated region fallthrough
CT: control target
= control target key end

     0   :  { %s365_s1 = inlined_call_operand.vmem [shape: bf16[256,128], index: 1, kind: input, shape index: {}]   ;;  %s366_s0 = inlined_call_operand.vmem [shape: f32[16,256], index: 0, kind: input, shape index: {}]   ;;  %s367_s2 = inlined_call_operand.vmem [shape: f32[1,128], index: 2, kind: input, shape index: {}]   ;;  %s368_s3 = inlined_call_operand.vmem [shape: f32[16,128], index: 3, kind: input, shape index: {}]   ;;  %s369_s4 = inlined_call_operand.vmem [shape: f32[16,128], index: 4, kind: output, shape index: {}]  }
   0x1   :  { %v249_v0 = vld [vmem:[%s365_s1 + $0x78] sm:$0xff]   ;;  %v251_v2 = vld [vmem:[%s365_s1 + $0x70] sm:$0xff]   ;;  %v253_v4 = vld [vmem:[%s365_s1 + $0x68] sm:$0xff]  }
   0x2   :  { %v250_v1 = vld [vmem:[%s365_s1 + $0x38] sm:$0xff]   ;;  %227 = vmatprep.subr.bf16.mxu0 %v249_v0  ;;  %v252_v3 = vld [vmem:[%s365_s1 + $0x30] sm:$0xff]   ;;  %v254_v5 = vld [vmem:[%s365_s1 + $0x28] sm:$0xff]  }
   0x3   :  { %228 = vmatpush3.bf16.msra.mxu0 %v250_v1  ;;  %v255_v6 = vld [vmem:[%s365_s1 + $0x60] sm:$0xff]   ;;  %v257_v8 = vld [vmem:[%s365_s1 + $0x58] sm:$0xff]   ;;  %v259_v10 = vld [vmem:[%s365_s1 + $0x50] sm:$0xff]  }
   0x4   :  { %229 = vmatprep.subr.bf16.mxu0 %v251_v2  ;;  %v256_v7 = vld [vmem:[%s365_s1 + $0x20] sm:$0xff]   ;;  %v258_v9 = vld [vmem:[%s365_s1 + $0x18] sm:$0xff]   ;;  %v19_v11 = vld [vmem:[%s366_s0 + $0x8] sm:$0xff] }
   0x5   :  { %v21_v12 = vld [vmem:[%s366_s0 + $0x18] sm:$0xff]  ;;  %v260_v14 = vld [vmem:[%s365_s1 + $0x10] sm:$0xff]   ;;  %v261_v15 = vld [vmem:[%s365_s1 + $0x48] sm:$0xff]  }
   0x6   :  { %v23_v13 = vpack.c.bf16 %v21_v12, %v19_v11  ;;  %v262_v16 = vld [vmem:[%s365_s1 + $0x8] sm:$0xff]   ;;  %v263_v17 = vld [vmem:[%s365_s1 + $0x40] sm:$0xff]   ;;  %v20_v20 = vld [vmem:[%s366_s0 + $0x10] sm:$0xff] }
   0x7   :  { %230 = vmatpush3.bf16.msra.mxu0 %v252_v3  ;;  %v264_v18 = vld [vmem:[%s365_s1] sm:$0xff]   ;;  %v201_v32 = vld [vmem:[%s368_s3 + $0x8] sm:$0xff] }
   0x8   :  { %231 = vmatprep.subr.bf16.mxu0 %v253_v4  ;;  %191 = vmatprep.mubr.bf16.mxu0 %v23_v13  ;;  %v18_v19 = vld [vmem:[%s366_s0] sm:$0xff] }
   0x9   :  { %v22_v21 = vpack.c.bf16 %v20_v20, %v18_v19  ;;  %v210_v23 = vld [vmem:[%s367_s2] ss:$0 sm:$0xff] }
   0xa   :  { %v200_v26 = vld [vmem:[%s368_s3] sm:$0xff] }
   0xb   :  { %232 = vmatpush3.bf16.msra.mxu0 %v254_v5 }
   0xc   :  { %233 = vmatprep.subr.bf16.mxu0 %v255_v6 }
   0xf   :  { %234 = vmatpush3.bf16.msra.mxu0 %v256_v7 }
  0x10   :  { %235 = vmatprep.subr.bf16.mxu0 %v257_v8 }
  0x13   :  { %236 = vmatpush3.bf16.msra.mxu0 %v258_v9 }
  0x14   :  { %237 = vmatprep.subr.bf16.mxu0 %v259_v10 }
  0x17   :  { %238 = vmatpush3.bf16.msra.mxu0 %v260_v14 }
  0x18   :  { %239 = vmatprep.subr.bf16.mxu0 %v261_v15 }
  0x1b   :  { %240 = vmatpush3.bf16.msra.mxu0 %v262_v16 }
  0x1c   :  { %241 = vmatprep.subr.bf16.mxu0 %v263_v17 }
  0x1f   :  { %242 = vmatpush3.bf16.msra.mxu0 %v264_v18 }
  0x22   :  { %192 = vmatmul.mubr.bf16.vlgmr.msra.gmra.mxu0 %v22_v21 }
  0xe2   :  { %v243_v22 = vpop.f32.mrf.mxu0 }
  0xe4   :  { %v244_v24 = vpop.f32.mrf.mxu0 }
  0xe5   :  { %v245_v25 = vadd.f32 %v244_v24, %v243_v22 }
  0xe6   :  { %v246_v27 = vpop.f32.mrf.mxu0 }
  0xe7   :  { %v194_v28 = vadd.f32 %v245_v25, %v210_v23 }
  0xe8   :  { %v247_v29 = vpop.f32.mrf.mxu0 }
  0xe9   :  { %v202_v30 = vadd.f32 %v200_v26, %v194_v28  ;;  %v248_v31 = vadd.f32 %v247_v29, %v246_v27 }
  0xeb   :  { %204 = vst [vmem:[%s369_s4] sm:$0xff] %v202_v30  ;;  %v197_v33 = vadd.f32 %v248_v31, %v210_v23 }
  0xed   :  { %v203_v34 = vadd.f32 %v201_v32, %v197_v33 }
  0xef   :  { %205 = vst [vmem:[%s369_s4 + $0x8] sm:$0xff] %v203_v34 }

// kernel: vit_forward.23
= control target key start
LH: loop header
LB: loop body
LE: loop exit
PB: predicated region body
PF: predicated region fallthrough
CT: control target
= control target key end

     0   :  { %v220_v1 = vmov 0.0   ;;  %vm221_vm0 = vmmov 0   ;;  %vm162_vm1 = vcmask 80896   ;;  %s291_s0 = inlined_call_operand.vmem [shape: f32[8,128], index: 0, kind: input, shape index: {}]   ;;  %s292_s3 = inlined_call_operand.vmem [shape: bf16[128,10], index: 3, kind: input, shape index: {}]   ;;  %s293_s1 = inlined_call_operand.vmem [shape: f32[1,128], index: 1, kind: input, shape index: {}]   ;;  %s294_s2 = inlined_call_operand.vmem [shape: f32[1,128], index: 2, kind: input, shape index: {}]   ;;  %s295_s4 = inlined_call_operand.vmem [shape: f32[1,10], index: 4, kind: input, shape index: {}]   ;;  %s296_s5 = inlined_call_operand.vmem [shape: f32[8,10], index: 5, kind: output, shape index: {}]  }
   0x1   :  { %v21_v0 = vld [vmem:[%s291_s0] sm:$0xff]  ;;  %188 = vmatprep.subr.bf16.mxu0 %v220_v1  ;;  %v210_v2 = vld [vmem:[%s292_s3 + $0x38] sm:$0xff]   ;;  %v211_v3 = vld [vmem:[%s292_s3 + $0x30] sm:$0xff]   ;;  %204 = vmatprep.mubr.msk.bf16.mxu0 %vm221_vm0, %v220_v1 }
   0x2   :  { %22 = vadd.xlane.f32.xlu0 %v21_v0  ;;  %189 = vmatpush3.bf16.msra.mxu0 %v210_v2  ;;  %v212_v8 = vld [vmem:[%s292_s3 + $0x28] sm:$0xff]   ;;  %v213_v9 = vld [vmem:[%s292_s3 + $0x20] sm:$0xff]   ;;  %v214_v10 = vld [vmem:[%s292_s3 + $0x18] sm:$0xff]  }
   0x3   :  { %190 = vmatprep.subr.bf16.mxu0 %v220_v1  ;;  %v215_v11 = vld [vmem:[%s292_s3 + $0x10] sm:$0xff]   ;;  %v216_v12 = vld [vmem:[%s292_s3 + $0x8] sm:$0xff]   ;;  %v217_v13 = vld [vmem:[%s292_s3] sm:$0xff]  }
   0x4   :  { %v168_v18 = vld [vmem:[%s293_s1] ss:$0 sm:$0xff] }
   0x5   :  { %v169_v20 = vld [vmem:[%s294_s2] ss:$0 sm:$0xff] }
   0x6   :  { %191 = vmatpush3.bf16.msra.mxu0 %v211_v3  ;;  %v170_v24 = vld [vmem:[%s295_s4] ss:$0 sm:$0xff] }
   0x7   :  { %192 = vmatprep.subr.bf16.mxu0 %v220_v1 }
   0xa   :  { %193 = vmatpush3.bf16.msra.mxu0 %v212_v8 }
   0xb   :  { %194 = vmatprep.subr.bf16.mxu0 %v220_v1 }
   0xe   :  { %195 = vmatpush3.bf16.msra.mxu0 %v213_v9 }
   0xf   :  { %196 = vmatprep.subr.bf16.mxu0 %v220_v1 }
  0x12   :  { %197 = vmatpush3.bf16.msra.mxu0 %v214_v10 }
  0x13   :  { %198 = vmatprep.subr.bf16.mxu0 %v220_v1 }
  0x16   :  { %199 = vmatpush3.bf16.msra.mxu0 %v215_v11 }
  0x17   :  { %200 = vmatprep.subr.bf16.mxu0 %v220_v1 }
  0x1a   :  { %201 = vmatpush3.bf16.msra.mxu0 %v216_v12 }
  0x1b   :  { %202 = vmatprep.subr.bf16.mxu0 %v220_v1 }
  0x1e   :  { %203 = vmatpush3.bf16.msra.mxu0 %v217_v13 }
  0x8b   :  { %v23_v4 = vpop.xlane.xlu0 %22 }
  0x8c   :  { %v25_v5 = vmul.f32 0.0078125, %v23_v4 }
  0x8e   :  { %v26_v6 = vsub.f32 %v21_v0, %v25_v5 }
  0x90   :  { %v27_v7 = vmul.f32 %v26_v6, %v26_v6 }
  0x92   :  { %28 = vadd.xlane.f32.xlu0 %v27_v7 }
 0x11b   :  { %v29_v14 = vpop.xlane.xlu0 %28 }
 0x11c   :  { %v30_v15 = vmul.f32 0.0078125, %v29_v14 }
 0x11e   :  { %v31_v16 = vadd.f32 1e-05, %v30_v15 }
 0x120   :  { %218 = vrsqrt.f32 %v31_v16 }
 0x12d   :  { %v219_v17 = vpop.eup %218 }
 0x12e   :  { %v33_v19 = vmul.f32 %v219_v17, %v26_v6 }
 0x130   :  { %v41_v21 = vmul.f32 %v168_v18, %v33_v19 }
 0x132   :  { %v49_v22 = vadd.f32 %v169_v20, %v41_v21 }
 0x134   :  { %v50_v23 = vpack.c.bf16 %v49_v22, %v49_v22 }
 0x136   :  { %205 = vmatmul.mubr.bf16.vlgmr.msra.gmra.mxu0 %v50_v23 }
 0x1f6   :  { %v156_v25 = vpop.f32.mrf.mxu0 }
 0x1f7   :  { %v157_v26 = vadd.f32 %v170_v24, %v156_v25 }
 0x1f8   :  { %v206_v27 = vpop.f32.mrf.mxu0 }
 0x1f9   :  { %163 = vst.msk [vmem:[%s296_s5] sm:$0xff] %vm162_vm1, %v157_v26 }
 0x1fa   :  { %v159_v28 = vpop.f32.mrf.mxu0 }
 0x1fc   :  { %v207_v29 = vpop.f32.mrf.mxu0 }

</bundles_post_ra>
